<compile_context>
chip_gen: v6e
topology: v6e:2x2x1
jax: 0.10.0
libtpu: 0.0.40
codegen_flags: <defaults>
</compile_context>

<pallas_src>
import math
from types import SimpleNamespace

import jax
import jax.numpy as jnp
from jax.experimental import pallas as pl
from jax.experimental.pallas import tpu as pltpu

CPAD = 128  # all channel dims padded to the 128-lane width


# ----------------------------------------------------------------------------
# Fused Bottleneck-block kernel (one image per grid step).
# ----------------------------------------------------------------------------
def _make_block_kernel(H1, W1, dilation, has_downsample):
    M1 = H1 * W1
    d = dilation

    def kernel(xs_ref, w1_ref, b1_ref, w2_ref, b2_ref, w3_ref, b3_ref, o_ref):
        xs = xs_ref[0]                                           # (M1, C) bf16

        # conv1 (+ fused downsample columns): one MXU dot, N = 128 or 256.
        y1 = jnp.dot(xs, w1_ref[...], preferred_element_type=jnp.float32)
        y1 = y1 + b1_ref[...]
        if has_downsample:
            h = jnp.maximum(y1[:, :CPAD], 0.0)                   # conv1+bn1+ReLU
            identity = y1[:, CPAD:]                              # downsample+bnd
        else:
            h = jnp.maximum(y1, 0.0)
            identity = xs.astype(jnp.float32)

        # Spatially zero-pad the conv1 output by `d` (value-level concat; the
        # padded block lives in VMEM/vregs -- no HBM im2col slab).
        h3 = h.reshape(H1, W1, CPAD)
        zw = jnp.zeros((H1, d, CPAD), jnp.float32)
        h3 = jnp.concatenate([zw, h3, zw], axis=1)               # (H1, W1+2d, C)
        zh = jnp.zeros((d, W1 + 2 * d, CPAD), jnp.float32)
        h3 = jnp.concatenate([zh, h3, zh], axis=0)               # (H1+2d, W1+2d, C)

        # conv2: 3x3 (dilation d, stride 1) as 9 shifted-window matmuls,
        # f32 accumulate on the MXU result.
        acc = None
        for ty in range(3):
            for tx in range(3):
                win = h3[ty * d:ty * d + H1, tx * d:tx * d + W1, :]
                win = win.reshape(M1, CPAD).astype(jnp.bfloat16)
                p = jnp.dot(win, w2_ref[ty * 3 + tx],
                            preferred_element_type=jnp.float32)
                acc = p if acc is None else acc + p
        h2 = jnp.maximum(acc + b2_ref[...], 0.0)                 # bn2 + ReLU

        # conv3 + bn3 + residual add + final ReLU.
        y3 = jnp.dot(h2.astype(jnp.bfloat16), w3_ref[...],
                     preferred_element_type=jnp.float32) + b3_ref[...]
        o_ref[0] = jnp.maximum(y3 + identity, 0.0).astype(o_ref.dtype)

    return kernel


def bottleneck_block(x, blk, H, W):
    """x: (N, H*W, CPAD) bf16.  Returns (y, H1, W1) with y: (N, H1*W1, CPAD) bf16."""
    N = x.shape[0]
    s = blk["s1"]
    if s > 1:
        xs = x.reshape(N, H, W, CPAD)[:, ::s, ::s, :]            # shared strided read
        H1, W1 = xs.shape[1], xs.shape[2]
        xs = xs.reshape(N, H1 * W1, CPAD)
    else:
        xs, H1, W1 = x, H, W
    M1 = H1 * W1
    n1 = blk["w1_mat"].shape[1]                  # CPAD, or 2*CPAD when downsample fused

    kernel = _make_block_kernel(H1, W1, blk["dilation"], blk["has_downsample"])
    # TODO(synk): for large spatial inputs add a row-tiling grid axis (with a
    # halo) instead of one-image-per-step blocks.
    y = pl.pallas_call(
        kernel,
        out_shape=jax.ShapeDtypeStruct((N, M1, CPAD), jnp.bfloat16),
        grid_spec=pltpu.PrefetchScalarGridSpec(
            num_scalar_prefetch=0,
            grid=(N,),                                    # batch>=2 -> both v7x TCs busy
            in_specs=[
                pl.BlockSpec((1, M1, CPAD), lambda n: (n, 0, 0)),
                pl.BlockSpec((CPAD, n1), lambda n: (0, 0)),
                pl.BlockSpec((1, n1), lambda n: (0, 0)),
                pl.BlockSpec((9, CPAD, CPAD), lambda n: (0, 0, 0)),
                pl.BlockSpec((1, CPAD), lambda n: (0, 0)),
                pl.BlockSpec((CPAD, CPAD), lambda n: (0, 0)),
                pl.BlockSpec((1, CPAD), lambda n: (0, 0)),
            ],
            out_specs=pl.BlockSpec((1, M1, CPAD), lambda n: (n, 0, 0)),
        ),
        compiler_params=pltpu.CompilerParams(
            dimension_semantics=("parallel",),
            vmem_limit_bytes=32 * 1024 * 1024),
    )(xs, blk["w1_mat"], blk["b1"], blk["w2_mat"], blk["b2"],
      blk["w3_mat"], blk["b3"])
    return y, H1, W1


# ----------------------------------------------------------------------------
# Parameter construction (mirrors the PyTorch __init__; FrozenBatchNorm2d
# buffers at init: weight=1, bias=0, running_mean=0, running_var=1, no eps).
# ----------------------------------------------------------------------------
def kaiming_uniform(key, shape, a=1.0):
    fan_in = shape[1] * shape[2] * shape[3]
    gain = math.sqrt(2.0 / (1.0 + a * a))
    bound = gain * math.sqrt(3.0 / fan_in)
    return jax.random.uniform(key, shape, jnp.float32, -bound, bound)


def frozen_bn_scale_bias(n):
    weight = jnp.ones((n,), jnp.float32)
    bias = jnp.zeros((n,), jnp.float32)
    running_mean = jnp.zeros((n,), jnp.float32)
    running_var = jnp.ones((n,), jnp.float32)
    scale = weight * jax.lax.rsqrt(running_var)   # no eps (maskrcnn-benchmark style)
    b = bias - running_mean * scale
    return scale, b


def conv1x1_folded(w, scale, bias):
    """1x1 conv + frozen BN -> padded (CPAD, CPAD) bf16 weight, (1, CPAD) f32 bias."""
    cout, cin = w.shape[:2]
    m = (w[:, :, 0, 0] * scale[:, None]).T                       # (Cin, Cout), BN folded
    m = jnp.pad(m, ((0, CPAD - cin), (0, CPAD - cout)))
    b = jnp.pad(bias, (0, CPAD - cout)).reshape(1, CPAD)
    return m.astype(jnp.bfloat16), b


def conv3x3_folded(w, scale, bias):
    """3x3 conv + frozen BN -> (9, CPAD, CPAD) bf16 tap weights, (1, CPAD) f32 bias."""
    cout, cin = w.shape[:2]
    taps = []
    for ty in range(3):
        for tx in range(3):
            t = (w[:, :, ty, tx] * scale[:, None]).T
            taps.append(jnp.pad(t, ((0, CPAD - cin), (0, CPAD - cout))))
    w_taps = jnp.stack(taps, axis=0).astype(jnp.bfloat16)
    b = jnp.pad(bias, (0, CPAD - cout)).reshape(1, CPAD)
    return w_taps, b


def build_resnet_head_params(key, stages, num_groups=1, width_per_group=8,
                             stride_in_1x1=True, stride_init=None,
                             res2_out_channels=16, dilation=1):
    assert num_groups == 1  # TODO(synk): grouped 3x3 conv (num_groups > 1) not implemented.
    stage2_relative_factor = 2 ** (stages[0].index - 1)
    stage2_bottleneck_channels = num_groups * width_per_group
    out_channels = res2_out_channels * stage2_relative_factor
    in_channels = out_channels // 2
    bottleneck_channels = stage2_bottleneck_channels * stage2_relative_factor
    assert max(in_channels, out_channels, bottleneck_channels) <= CPAD

    params = {"stages": [], "in_channels": in_channels, "out_channels": out_channels}
    stride = stride_init
    ic = in_channels
    for stage in stages:
        if not stride:
            stride = int(stage.index > 1) + 1
        blocks = []
        s = stride
        for _ in range(stage.block_count):
            key, k1, k2, k3, kd = jax.random.split(key, 5)
            has_down = ic != out_channels       # channel-mismatch rule, like the reference
            eff_stride = 1 if dilation > 1 else s
            s1, s3 = (eff_stride, 1) if stride_in_1x1 else (1, eff_stride)
            down_stride = s if dilation == 1 else 1
            # TODO(synk): conv2-strided variant (stride_in_1x1=False with stride>1)
            # is not supported by the fused block kernel.
            assert s3 == 1
            assert (not has_down) or down_stride == s1
            assert has_down or s1 == 1          # residual shape must match (reference rule)

            blk = {"s1": s1, "dilation": dilation, "has_downsample": has_down}

            w1 = kaiming_uniform(k1, (bottleneck_channels, ic, 1, 1))
            w1_mat, b1 = conv1x1_folded(w1, *frozen_bn_scale_bias(bottleneck_channels))
            if has_down:
                wd = kaiming_uniform(kd, (out_channels, ic, 1, 1))
                wd_mat, bd = conv1x1_folded(wd, *frozen_bn_scale_bias(out_channels))
                # fused conv1 + downsample: one dot with 256 output columns.
                blk["w1_mat"] = jnp.concatenate([w1_mat, wd_mat], axis=1)
                blk["b1"] = jnp.concatenate([b1, bd], axis=1)
            else:
                blk["w1_mat"], blk["b1"] = w1_mat, b1

            w2 = kaiming_uniform(
                k2, (bottleneck_channels, bottleneck_channels // num_groups, 3, 3))
            blk["w2_mat"], blk["b2"] = conv3x3_folded(
                w2, *frozen_bn_scale_bias(bottleneck_channels))

            w3 = kaiming_uniform(k3, (out_channels, bottleneck_channels, 1, 1))
            blk["w3_mat"], blk["b3"] = conv1x1_folded(
                w3, *frozen_bn_scale_bias(out_channels))

            blocks.append(blk)
            s = 1
            ic = out_channels
        params["stages"].append(blocks)
        stride = None
    return params


# ----------------------------------------------------------------------------
# Forward pass (matches Bottleneck / ResNetHead forward; FrozenBN folded in).
# ----------------------------------------------------------------------------
def resnet_head_forward(x_nchw, params):
    n, c, H, W = x_nchw.shape
    x = jnp.transpose(x_nchw, (0, 2, 3, 1))                      # NCHW -> NHWC
    x = jnp.pad(x, ((0, 0), (0, 0), (0, 0), (0, CPAD - c)))      # pad C to 128 lanes
    x = x.astype(jnp.bfloat16).reshape(n, H * W, CPAD)
    for stage_blocks in params["stages"]:
        for blk in stage_blocks:
            x, H, W = bottleneck_block(x, blk, H, W)
    x = x.reshape(n, H, W, CPAD)[..., :params["out_channels"]].astype(jnp.float32)
    return jnp.transpose(x, (0, 3, 1, 2))                        # NHWC -> NCHW


# ----------------------------------------------------------------------------
if __name__ == "__main__":
    key = jax.random.PRNGKey(0)
    k_params, k_x = jax.random.split(key)

    # Small ResNetHead config: one stage (index=2, 2 blocks).
    #   factor = 2, out_channels = 32, in_channels = 16, bottleneck = 16,
    #   first block stride = 2 (stride_in_1x1=True), fused downsample 1x1/s2.
    stages = [SimpleNamespace(index=2, block_count=2)]
    params = build_resnet_head_params(
        k_params, stages, num_groups=1, width_per_group=8,
        stride_in_1x1=True, stride_init=None, res2_out_channels=16, dilation=1)

    # Input is NCHW like the PyTorch module: (batch=2, C=16, H=16, W=16).
    x = jax.random.normal(k_x, (2, params["in_channels"], 16, 16), jnp.float32)

    fwd = jax.jit(lambda t: resnet_head_forward(t, params))
    y = jax.block_until_ready(fwd(x))

    expected = (2, params["out_channels"], 8, 8)
    assert y.shape == expected, (y.shape, expected)
    assert bool(jnp.all(jnp.isfinite(y)))
    print("KERNEL_OK")
</pallas_src>

<mosaic_0001>
module attributes {stable_mosaic.version = 11 : i64} {
  func.func @kernel(%arg0: i32, %arg1: memref<1x64x128xbf16, #tpu.memory_space<vmem>>, %arg2: memref<128x256xbf16, #tpu.memory_space<vmem>>, %arg3: memref<1x256xf32, #tpu.memory_space<vmem>>, %arg4: memref<9x128x128xbf16, #tpu.memory_space<vmem>>, %arg5: memref<1x128xf32, #tpu.memory_space<vmem>>, %arg6: memref<128x128xbf16, #tpu.memory_space<vmem>>, %arg7: memref<1x128xf32, #tpu.memory_space<vmem>>, %arg8: memref<1x64x128xbf16, #tpu.memory_space<vmem>>) attributes {dimension_semantics = [#tpu.dimension_semantics<parallel>], iteration_bounds = array<i64: 2>, scalar_prefetch = 0 : i64, scratch_operands = 0 : i64, tpu.core_type = #tpu.core_type<tc>, window_params = [{transform_indices = @transform_0, window_bounds = array<i64: 1, 64, 128>}, {pipeline_mode = #tpu.pipeline_mode<synchronous>, transform_indices = @transform_1, window_bounds = array<i64: 128, 256>}, {pipeline_mode = #tpu.pipeline_mode<synchronous>, transform_indices = @transform_2, window_bounds = array<i64: 1, 256>}, {pipeline_mode = #tpu.pipeline_mode<synchronous>, transform_indices = @transform_3, window_bounds = array<i64: 9, 128, 128>}, {pipeline_mode = #tpu.pipeline_mode<synchronous>, transform_indices = @transform_4, window_bounds = array<i64: 1, 128>}, {pipeline_mode = #tpu.pipeline_mode<synchronous>, transform_indices = @transform_5, window_bounds = array<i64: 128, 128>}, {pipeline_mode = #tpu.pipeline_mode<synchronous>, transform_indices = @transform_6, window_bounds = array<i64: 1, 128>}, {transform_indices = @transform_7, window_bounds = array<i64: 1, 64, 128>}]} {
    %c0 = arith.constant 0 : index
    %c0_0 = arith.constant 0 : index
    %c0_1 = arith.constant 0 : index
    %0 = vector.load %arg1[%c0, %c0_0, %c0_1] : memref<1x64x128xbf16, #tpu.memory_space<vmem>>, vector<1x64x128xbf16>
    %1 = vector.shape_cast %0 : vector<1x64x128xbf16> to vector<64x128xbf16>
    %c0_2 = arith.constant 0 : index
    %c0_3 = arith.constant 0 : index
    %2 = vector.load %arg2[%c0_2, %c0_3] : memref<128x256xbf16, #tpu.memory_space<vmem>>, vector<128x256xbf16>
    %cst = arith.constant dense<0.000000e+00> : vector<64x256xf32>
    %3 = tpu.matmul %1, %2, %cst {dimension_numbers = #tpu.dot_dimension_numbers<[1], [0], [0], [1], [0, 0, 1, 1], [], []>} : vector<64x128xbf16>, vector<128x256xbf16>, vector<64x256xf32> -> vector<64x256xf32>
    %c0_4 = arith.constant 0 : index
    %c0_5 = arith.constant 0 : index
    %4 = vector.load %arg3[%c0_4, %c0_5] : memref<1x256xf32, #tpu.memory_space<vmem>>, vector<1x256xf32>
    %5 = vector.broadcast %4 : vector<1x256xf32> to vector<64x256xf32>
    %6 = arith.addf %3, %5 : vector<64x256xf32>
    %7 = vector.extract_strided_slice %6 {offsets = [0, 0], sizes = [64, 128], strides = [1, 1]} : vector<64x256xf32> to vector<64x128xf32>
    %cst_6 = arith.constant 0.000000e+00 : f32
    %8 = vector.broadcast %cst_6 : f32 to vector<64x128xf32>
    %9 = arith.maximumf %7, %8 : vector<64x128xf32>
    %10 = vector.extract_strided_slice %6 {offsets = [0, 128], sizes = [64, 128], strides = [1, 1]} : vector<64x256xf32> to vector<64x128xf32>
    %11 = vector.shape_cast %9 : vector<64x128xf32> to vector<8x8x128xf32>
    %cst_7 = arith.constant 0.000000e+00 : f32
    %12 = vector.broadcast %cst_7 : f32 to vector<8x1x128xf32>
    %13 = tpu.concatenate %12, %11, %12 in 1 : vector<8x1x128xf32>, vector<8x8x128xf32>, vector<8x1x128xf32> -> vector<8x10x128xf32>
    %cst_8 = arith.constant 0.000000e+00 : f32
    %14 = vector.broadcast %cst_8 : f32 to vector<1x10x128xf32>
    %15 = tpu.concatenate %14, %13, %14 in 0 : vector<1x10x128xf32>, vector<8x10x128xf32>, vector<1x10x128xf32> -> vector<10x10x128xf32>
    %16 = vector.extract_strided_slice %15 {offsets = [0, 0, 0], sizes = [8, 8, 128], strides = [1, 1, 1]} : vector<10x10x128xf32> to vector<8x8x128xf32>
    %17 = vector.shape_cast %16 : vector<8x8x128xf32> to vector<64x128xf32>
    %18 = arith.truncf %17 : vector<64x128xf32> to vector<64x128xbf16>
    %c0_9 = arith.constant 0 : index
    %c0_10 = arith.constant 0 : index
    %c0_11 = arith.constant 0 : index
    %19 = vector.load %arg4[%c0_9, %c0_10, %c0_11] : memref<9x128x128xbf16, #tpu.memory_space<vmem>>, vector<1x128x128xbf16>
    %20 = vector.shape_cast %19 : vector<1x128x128xbf16> to vector<128x128xbf16>
    %cst_12 = arith.constant dense<0.000000e+00> : vector<64x128xf32>
    %21 = tpu.matmul %18, %20, %cst_12 {dimension_numbers = #tpu.dot_dimension_numbers<[1], [0], [0], [1], [0, 0, 1, 1], [], []>} : vector<64x128xbf16>, vector<128x128xbf16>, vector<64x128xf32> -> vector<64x128xf32>
    %22 = vector.extract_strided_slice %15 {offsets = [0, 1, 0], sizes = [8, 8, 128], strides = [1, 1, 1]} : vector<10x10x128xf32> to vector<8x8x128xf32>
    %23 = vector.shape_cast %22 : vector<8x8x128xf32> to vector<64x128xf32>
    %24 = arith.truncf %23 : vector<64x128xf32> to vector<64x128xbf16>
    %c1 = arith.constant 1 : index
    %c0_13 = arith.constant 0 : index
    %c0_14 = arith.constant 0 : index
    %25 = vector.load %arg4[%c1, %c0_13, %c0_14] : memref<9x128x128xbf16, #tpu.memory_space<vmem>>, vector<1x128x128xbf16>
    %26 = vector.shape_cast %25 : vector<1x128x128xbf16> to vector<128x128xbf16>
    %cst_15 = arith.constant dense<0.000000e+00> : vector<64x128xf32>
    %27 = tpu.matmul %24, %26, %cst_15 {dimension_numbers = #tpu.dot_dimension_numbers<[1], [0], [0], [1], [0, 0, 1, 1], [], []>} : vector<64x128xbf16>, vector<128x128xbf16>, vector<64x128xf32> -> vector<64x128xf32>
    %28 = arith.addf %21, %27 : vector<64x128xf32>
    %29 = vector.extract_strided_slice %15 {offsets = [0, 2, 0], sizes = [8, 8, 128], strides = [1, 1, 1]} : vector<10x10x128xf32> to vector<8x8x128xf32>
    %30 = vector.shape_cast %29 : vector<8x8x128xf32> to vector<64x128xf32>
    %31 = arith.truncf %30 : vector<64x128xf32> to vector<64x128xbf16>
    %c2 = arith.constant 2 : index
    %c0_16 = arith.constant 0 : index
    %c0_17 = arith.constant 0 : index
    %32 = vector.load %arg4[%c2, %c0_16, %c0_17] : memref<9x128x128xbf16, #tpu.memory_space<vmem>>, vector<1x128x128xbf16>
    %33 = vector.shape_cast %32 : vector<1x128x128xbf16> to vector<128x128xbf16>
    %cst_18 = arith.constant dense<0.000000e+00> : vector<64x128xf32>
    %34 = tpu.matmul %31, %33, %cst_18 {dimension_numbers = #tpu.dot_dimension_numbers<[1], [0], [0], [1], [0, 0, 1, 1], [], []>} : vector<64x128xbf16>, vector<128x128xbf16>, vector<64x128xf32> -> vector<64x128xf32>
    %35 = arith.addf %28, %34 : vector<64x128xf32>
    %36 = vector.extract_strided_slice %15 {offsets = [1, 0, 0], sizes = [8, 8, 128], strides = [1, 1, 1]} : vector<10x10x128xf32> to vector<8x8x128xf32>
    %37 = vector.shape_cast %36 : vector<8x8x128xf32> to vector<64x128xf32>
    %38 = arith.truncf %37 : vector<64x128xf32> to vector<64x128xbf16>
    %c3 = arith.constant 3 : index
    %c0_19 = arith.constant 0 : index
    %c0_20 = arith.constant 0 : index
    %39 = vector.load %arg4[%c3, %c0_19, %c0_20] : memref<9x128x128xbf16, #tpu.memory_space<vmem>>, vector<1x128x128xbf16>
    %40 = vector.shape_cast %39 : vector<1x128x128xbf16> to vector<128x128xbf16>
    %cst_21 = arith.constant dense<0.000000e+00> : vector<64x128xf32>
    %41 = tpu.matmul %38, %40, %cst_21 {dimension_numbers = #tpu.dot_dimension_numbers<[1], [0], [0], [1], [0, 0, 1, 1], [], []>} : vector<64x128xbf16>, vector<128x128xbf16>, vector<64x128xf32> -> vector<64x128xf32>
    %42 = arith.addf %35, %41 : vector<64x128xf32>
    %43 = vector.extract_strided_slice %15 {offsets = [1, 1, 0], sizes = [8, 8, 128], strides = [1, 1, 1]} : vector<10x10x128xf32> to vector<8x8x128xf32>
    %44 = vector.shape_cast %43 : vector<8x8x128xf32> to vector<64x128xf32>
    %45 = arith.truncf %44 : vector<64x128xf32> to vector<64x128xbf16>
    %c4 = arith.constant 4 : index
    %c0_22 = arith.constant 0 : index
    %c0_23 = arith.constant 0 : index
    %46 = vector.load %arg4[%c4, %c0_22, %c0_23] : memref<9x128x128xbf16, #tpu.memory_space<vmem>>, vector<1x128x128xbf16>
    %47 = vector.shape_cast %46 : vector<1x128x128xbf16> to vector<128x128xbf16>
    %cst_24 = arith.constant dense<0.000000e+00> : vector<64x128xf32>
    %48 = tpu.matmul %45, %47, %cst_24 {dimension_numbers = #tpu.dot_dimension_numbers<[1], [0], [0], [1], [0, 0, 1, 1], [], []>} : vector<64x128xbf16>, vector<128x128xbf16>, vector<64x128xf32> -> vector<64x128xf32>
    %49 = arith.addf %42, %48 : vector<64x128xf32>
    %50 = vector.extract_strided_slice %15 {offsets = [1, 2, 0], sizes = [8, 8, 128], strides = [1, 1, 1]} : vector<10x10x128xf32> to vector<8x8x128xf32>
    %51 = vector.shape_cast %50 : vector<8x8x128xf32> to vector<64x128xf32>
    %52 = arith.truncf %51 : vector<64x128xf32> to vector<64x128xbf16>
    %c5 = arith.constant 5 : index
    %c0_25 = arith.constant 0 : index
    %c0_26 = arith.constant 0 : index
    %53 = vector.load %arg4[%c5, %c0_25, %c0_26] : memref<9x128x128xbf16, #tpu.memory_space<vmem>>, vector<1x128x128xbf16>
    %54 = vector.shape_cast %53 : vector<1x128x128xbf16> to vector<128x128xbf16>
    %cst_27 = arith.constant dense<0.000000e+00> : vector<64x128xf32>
    %55 = tpu.matmul %52, %54, %cst_27 {dimension_numbers = #tpu.dot_dimension_numbers<[1], [0], [0], [1], [0, 0, 1, 1], [], []>} : vector<64x128xbf16>, vector<128x128xbf16>, vector<64x128xf32> -> vector<64x128xf32>
    %56 = arith.addf %49, %55 : vector<64x128xf32>
    %57 = vector.extract_strided_slice %15 {offsets = [2, 0, 0], sizes = [8, 8, 128], strides = [1, 1, 1]} : vector<10x10x128xf32> to vector<8x8x128xf32>
    %58 = vector.shape_cast %57 : vector<8x8x128xf32> to vector<64x128xf32>
    %59 = arith.truncf %58 : vector<64x128xf32> to vector<64x128xbf16>
    %c6 = arith.constant 6 : index
    %c0_28 = arith.constant 0 : index
    %c0_29 = arith.constant 0 : index
    %60 = vector.load %arg4[%c6, %c0_28, %c0_29] : memref<9x128x128xbf16, #tpu.memory_space<vmem>>, vector<1x128x128xbf16>
    %61 = vector.shape_cast %60 : vector<1x128x128xbf16> to vector<128x128xbf16>
    %cst_30 = arith.constant dense<0.000000e+00> : vector<64x128xf32>
    %62 = tpu.matmul %59, %61, %cst_30 {dimension_numbers = #tpu.dot_dimension_numbers<[1], [0], [0], [1], [0, 0, 1, 1], [], []>} : vector<64x128xbf16>, vector<128x128xbf16>, vector<64x128xf32> -> vector<64x128xf32>
    %63 = arith.addf %56, %62 : vector<64x128xf32>
    %64 = vector.extract_strided_slice %15 {offsets = [2, 1, 0], sizes = [8, 8, 128], strides = [1, 1, 1]} : vector<10x10x128xf32> to vector<8x8x128xf32>
    %65 = vector.shape_cast %64 : vector<8x8x128xf32> to vector<64x128xf32>
    %66 = arith.truncf %65 : vector<64x128xf32> to vector<64x128xbf16>
    %c7 = arith.constant 7 : index
    %c0_31 = arith.constant 0 : index
    %c0_32 = arith.constant 0 : index
    %67 = vector.load %arg4[%c7, %c0_31, %c0_32] : memref<9x128x128xbf16, #tpu.memory_space<vmem>>, vector<1x128x128xbf16>
    %68 = vector.shape_cast %67 : vector<1x128x128xbf16> to vector<128x128xbf16>
    %cst_33 = arith.constant dense<0.000000e+00> : vector<64x128xf32>
    %69 = tpu.matmul %66, %68, %cst_33 {dimension_numbers = #tpu.dot_dimension_numbers<[1], [0], [0], [1], [0, 0, 1, 1], [], []>} : vector<64x128xbf16>, vector<128x128xbf16>, vector<64x128xf32> -> vector<64x128xf32>
    %70 = arith.addf %63, %69 : vector<64x128xf32>
    %71 = vector.extract_strided_slice %15 {offsets = [2, 2, 0], sizes = [8, 8, 128], strides = [1, 1, 1]} : vector<10x10x128xf32> to vector<8x8x128xf32>
    %72 = vector.shape_cast %71 : vector<8x8x128xf32> to vector<64x128xf32>
    %73 = arith.truncf %72 : vector<64x128xf32> to vector<64x128xbf16>
    %c8 = arith.constant 8 : index
    %c0_34 = arith.constant 0 : index
    %c0_35 = arith.constant 0 : index
    %74 = vector.load %arg4[%c8, %c0_34, %c0_35] : memref<9x128x128xbf16, #tpu.memory_space<vmem>>, vector<1x128x128xbf16>
    %75 = vector.shape_cast %74 : vector<1x128x128xbf16> to vector<128x128xbf16>
    %cst_36 = arith.constant dense<0.000000e+00> : vector<64x128xf32>
    %76 = tpu.matmul %73, %75, %cst_36 {dimension_numbers = #tpu.dot_dimension_numbers<[1], [0], [0], [1], [0, 0, 1, 1], [], []>} : vector<64x128xbf16>, vector<128x128xbf16>, vector<64x128xf32> -> vector<64x128xf32>
    %77 = arith.addf %70, %76 : vector<64x128xf32>
    %c0_37 = arith.constant 0 : index
    %c0_38 = arith.constant 0 : index
    %78 = vector.load %arg5[%c0_37, %c0_38] : memref<1x128xf32, #tpu.memory_space<vmem>>, vector<1x128xf32>
    %79 = vector.broadcast %78 : vector<1x128xf32> to vector<64x128xf32>
    %80 = arith.addf %77, %79 : vector<64x128xf32>
    %cst_39 = arith.constant 0.000000e+00 : f32
    %81 = vector.broadcast %cst_39 : f32 to vector<64x128xf32>
    %82 = arith.maximumf %80, %81 : vector<64x128xf32>
    %83 = arith.truncf %82 : vector<64x128xf32> to vector<64x128xbf16>
    %c0_40 = arith.constant 0 : index
    %c0_41 = arith.constant 0 : index
    %84 = vector.load %arg6[%c0_40, %c0_41] : memref<128x128xbf16, #tpu.memory_space<vmem>>, vector<128x128xbf16>
    %cst_42 = arith.constant dense<0.000000e+00> : vector<64x128xf32>
    %85 = tpu.matmul %83, %84, %cst_42 {dimension_numbers = #tpu.dot_dimension_numbers<[1], [0], [0], [1], [0, 0, 1, 1], [], []>} : vector<64x128xbf16>, vector<128x128xbf16>, vector<64x128xf32> -> vector<64x128xf32>
    %c0_43 = arith.constant 0 : index
    %c0_44 = arith.constant 0 : index
    %86 = vector.load %arg7[%c0_43, %c0_44] : memref<1x128xf32, #tpu.memory_space<vmem>>, vector<1x128xf32>
    %87 = vector.broadcast %86 : vector<1x128xf32> to vector<64x128xf32>
    %88 = arith.addf %85, %87 : vector<64x128xf32>
    %89 = arith.addf %88, %10 : vector<64x128xf32>
    %cst_45 = arith.constant 0.000000e+00 : f32
    %90 = vector.broadcast %cst_45 : f32 to vector<64x128xf32>
    %91 = arith.maximumf %89, %90 : vector<64x128xf32>
    %92 = arith.truncf %91 : vector<64x128xf32> to vector<64x128xbf16>
    %c0_46 = arith.constant 0 : index
    %c0_47 = arith.constant 0 : index
    %c0_48 = arith.constant 0 : index
    %93 = vector.load %arg8[%c0_46, %c0_47, %c0_48] : memref<1x64x128xbf16, #tpu.memory_space<vmem>>, vector<1x64x128xbf16>
    %94 = vector.shape_cast %93 : vector<1x64x128xbf16> to vector<64x128xbf16>
    %95 = vector.shape_cast %92 : vector<64x128xbf16> to vector<1x64x128xbf16>
    tpu.vector_store %arg8[%c0_46, %c0_47, %c0_48], %95 {strides = array<i32>} : memref<1x64x128xbf16, #tpu.memory_space<vmem>>, vector<1x64x128xbf16>,
    return
  }
  func.func @transform_0(%arg0: i32) -> (i32, i32, i32) {
    %c0_i32 = arith.constant 0 : i32
    %c0_i32_0 = arith.constant 0 : i32
    %c0_i32_1 = arith.constant 0 : i32
    return %arg0, %c0_i32, %c0_i32_0 : i32, i32, i32
  }
  func.func @transform_1(%arg0: i32) -> (i32, i32) {
    %c0_i32 = arith.constant 0 : i32
    %c0_i32_0 = arith.constant 0 : i32
    %c0_i32_1 = arith.constant 0 : i32
    return %c0_i32, %c0_i32_0 : i32, i32
  }
  func.func @transform_2(%arg0: i32) -> (i32, i32) {
    %c0_i32 = arith.constant 0 : i32
    %c0_i32_0 = arith.constant 0 : i32
    %c0_i32_1 = arith.constant 0 : i32
    return %c0_i32, %c0_i32_0 : i32, i32
  }
  func.func @transform_3(%arg0: i32) -> (i32, i32, i32) {
    %c0_i32 = arith.constant 0 : i32
    %c0_i32_0 = arith.constant 0 : i32
    %c0_i32_1 = arith.constant 0 : i32
    %c0_i32_2 = arith.constant 0 : i32
    return %c0_i32, %c0_i32_0, %c0_i32_1 : i32, i32, i32
  }
  func.func @transform_4(%arg0: i32) -> (i32, i32) {
    %c0_i32 = arith.constant 0 : i32
    %c0_i32_0 = arith.constant 0 : i32
    %c0_i32_1 = arith.constant 0 : i32
    return %c0_i32, %c0_i32_0 : i32, i32
  }
  func.func @transform_5(%arg0: i32) -> (i32, i32) {
    %c0_i32 = arith.constant 0 : i32
    %c0_i32_0 = arith.constant 0 : i32
    %c0_i32_1 = arith.constant 0 : i32
    return %c0_i32, %c0_i32_0 : i32, i32
  }
  func.func @transform_6(%arg0: i32) -> (i32, i32) {
    %c0_i32 = arith.constant 0 : i32
    %c0_i32_0 = arith.constant 0 : i32
    %c0_i32_1 = arith.constant 0 : i32
    return %c0_i32, %c0_i32_0 : i32, i32
  }
  func.func @transform_7(%arg0: i32) -> (i32, i32, i32) {
    %c0_i32 = arith.constant 0 : i32
    %c0_i32_0 = arith.constant 0 : i32
    %c0_i32_1 = arith.constant 0 : i32
    return %arg0, %c0_i32, %c0_i32_0 : i32, i32, i32
  }
}

module attributes {stable_mosaic.version = 11 : i64} {
  func.func @kernel(%arg0: i32, %arg1: memref<1x64x128xbf16, #tpu.memory_space<vmem>>, %arg2: memref<128x128xbf16, #tpu.memory_space<vmem>>, %arg3: memref<1x128xf32, #tpu.memory_space<vmem>>, %arg4: memref<9x128x128xbf16, #tpu.memory_space<vmem>>, %arg5: memref<1x128xf32, #tpu.memory_space<vmem>>, %arg6: memref<128x128xbf16, #tpu.memory_space<vmem>>, %arg7: memref<1x128xf32, #tpu.memory_space<vmem>>, %arg8: memref<1x64x128xbf16, #tpu.memory_space<vmem>>) attributes {dimension_semantics = [#tpu.dimension_semantics<parallel>], iteration_bounds = array<i64: 2>, scalar_prefetch = 0 : i64, scratch_operands = 0 : i64, tpu.core_type = #tpu.core_type<tc>, window_params = [{transform_indices = @transform_0, window_bounds = array<i64: 1, 64, 128>}, {pipeline_mode = #tpu.pipeline_mode<synchronous>, transform_indices = @transform_1, window_bounds = array<i64: 128, 128>}, {pipeline_mode = #tpu.pipeline_mode<synchronous>, transform_indices = @transform_2, window_bounds = array<i64: 1, 128>}, {pipeline_mode = #tpu.pipeline_mode<synchronous>, transform_indices = @transform_3, window_bounds = array<i64: 9, 128, 128>}, {pipeline_mode = #tpu.pipeline_mode<synchronous>, transform_indices = @transform_4, window_bounds = array<i64: 1, 128>}, {pipeline_mode = #tpu.pipeline_mode<synchronous>, transform_indices = @transform_5, window_bounds = array<i64: 128, 128>}, {pipeline_mode = #tpu.pipeline_mode<synchronous>, transform_indices = @transform_6, window_bounds = array<i64: 1, 128>}, {transform_indices = @transform_7, window_bounds = array<i64: 1, 64, 128>}]} {
    %c0 = arith.constant 0 : index
    %c0_0 = arith.constant 0 : index
    %c0_1 = arith.constant 0 : index
    %0 = vector.load %arg1[%c0, %c0_0, %c0_1] : memref<1x64x128xbf16, #tpu.memory_space<vmem>>, vector<1x64x128xbf16>
    %1 = vector.shape_cast %0 : vector<1x64x128xbf16> to vector<64x128xbf16>
    %c0_2 = arith.constant 0 : index
    %c0_3 = arith.constant 0 : index
    %2 = vector.load %arg2[%c0_2, %c0_3] : memref<128x128xbf16, #tpu.memory_space<vmem>>, vector<128x128xbf16>
    %cst = arith.constant dense<0.000000e+00> : vector<64x128xf32>
    %3 = tpu.matmul %1, %2, %cst {dimension_numbers = #tpu.dot_dimension_numbers<[1], [0], [0], [1], [0, 0, 1, 1], [], []>} : vector<64x128xbf16>, vector<128x128xbf16>, vector<64x128xf32> -> vector<64x128xf32>
    %c0_4 = arith.constant 0 : index
    %c0_5 = arith.constant 0 : index
    %4 = vector.load %arg3[%c0_4, %c0_5] : memref<1x128xf32, #tpu.memory_space<vmem>>, vector<1x128xf32>
    %5 = vector.broadcast %4 : vector<1x128xf32> to vector<64x128xf32>
    %6 = arith.addf %3, %5 : vector<64x128xf32>
    %cst_6 = arith.constant 0.000000e+00 : f32
    %7 = vector.broadcast %cst_6 : f32 to vector<64x128xf32>
    %8 = arith.maximumf %6, %7 : vector<64x128xf32>
    %9 = arith.extf %1 : vector<64x128xbf16> to vector<64x128xf32>
    %10 = vector.shape_cast %8 : vector<64x128xf32> to vector<8x8x128xf32>
    %cst_7 = arith.constant 0.000000e+00 : f32
    %11 = vector.broadcast %cst_7 : f32 to vector<8x1x128xf32>
    %12 = tpu.concatenate %11, %10, %11 in 1 : vector<8x1x128xf32>, vector<8x8x128xf32>, vector<8x1x128xf32> -> vector<8x10x128xf32>
    %cst_8 = arith.constant 0.000000e+00 : f32
    %13 = vector.broadcast %cst_8 : f32 to vector<1x10x128xf32>
    %14 = tpu.concatenate %13, %12, %13 in 0 : vector<1x10x128xf32>, vector<8x10x128xf32>, vector<1x10x128xf32> -> vector<10x10x128xf32>
    %15 = vector.extract_strided_slice %14 {offsets = [0, 0, 0], sizes = [8, 8, 128], strides = [1, 1, 1]} : vector<10x10x128xf32> to vector<8x8x128xf32>
    %16 = vector.shape_cast %15 : vector<8x8x128xf32> to vector<64x128xf32>
    %17 = arith.truncf %16 : vector<64x128xf32> to vector<64x128xbf16>
    %c0_9 = arith.constant 0 : index
    %c0_10 = arith.constant 0 : index
    %c0_11 = arith.constant 0 : index
    %18 = vector.load %arg4[%c0_9, %c0_10, %c0_11] : memref<9x128x128xbf16, #tpu.memory_space<vmem>>, vector<1x128x128xbf16>
    %19 = vector.shape_cast %18 : vector<1x128x128xbf16> to vector<128x128xbf16>
    %cst_12 = arith.constant dense<0.000000e+00> : vector<64x128xf32>
    %20 = tpu.matmul %17, %19, %cst_12 {dimension_numbers = #tpu.dot_dimension_numbers<[1], [0], [0], [1], [0, 0, 1, 1], [], []>} : vector<64x128xbf16>, vector<128x128xbf16>, vector<64x128xf32> -> vector<64x128xf32>
    %21 = vector.extract_strided_slice %14 {offsets = [0, 1, 0], sizes = [8, 8, 128], strides = [1, 1, 1]} : vector<10x10x128xf32> to vector<8x8x128xf32>
    %22 = vector.shape_cast %21 : vector<8x8x128xf32> to vector<64x128xf32>
    %23 = arith.truncf %22 : vector<64x128xf32> to vector<64x128xbf16>
    %c1 = arith.constant 1 : index
    %c0_13 = arith.constant 0 : index
    %c0_14 = arith.constant 0 : index
    %24 = vector.load %arg4[%c1, %c0_13, %c0_14] : memref<9x128x128xbf16, #tpu.memory_space<vmem>>, vector<1x128x128xbf16>
    %25 = vector.shape_cast %24 : vector<1x128x128xbf16> to vector<128x128xbf16>
    %cst_15 = arith.constant dense<0.000000e+00> : vector<64x128xf32>
    %26 = tpu.matmul %23, %25, %cst_15 {dimension_numbers = #tpu.dot_dimension_numbers<[1], [0], [0], [1], [0, 0, 1, 1], [], []>} : vector<64x128xbf16>, vector<128x128xbf16>, vector<64x128xf32> -> vector<64x128xf32>
    %27 = arith.addf %20, %26 : vector<64x128xf32>
    %28 = vector.extract_strided_slice %14 {offsets = [0, 2, 0], sizes = [8, 8, 128], strides = [1, 1, 1]} : vector<10x10x128xf32> to vector<8x8x128xf32>
    %29 = vector.shape_cast %28 : vector<8x8x128xf32> to vector<64x128xf32>
    %30 = arith.truncf %29 : vector<64x128xf32> to vector<64x128xbf16>
    %c2 = arith.constant 2 : index
    %c0_16 = arith.constant 0 : index
    %c0_17 = arith.constant 0 : index
    %31 = vector.load %arg4[%c2, %c0_16, %c0_17] : memref<9x128x128xbf16, #tpu.memory_space<vmem>>, vector<1x128x128xbf16>
    %32 = vector.shape_cast %31 : vector<1x128x128xbf16> to vector<128x128xbf16>
    %cst_18 = arith.constant dense<0.000000e+00> : vector<64x128xf32>
    %33 = tpu.matmul %30, %32, %cst_18 {dimension_numbers = #tpu.dot_dimension_numbers<[1], [0], [0], [1], [0, 0, 1, 1], [], []>} : vector<64x128xbf16>, vector<128x128xbf16>, vector<64x128xf32> -> vector<64x128xf32>
    %34 = arith.addf %27, %33 : vector<64x128xf32>
    %35 = vector.extract_strided_slice %14 {offsets = [1, 0, 0], sizes = [8, 8, 128], strides = [1, 1, 1]} : vector<10x10x128xf32> to vector<8x8x128xf32>
    %36 = vector.shape_cast %35 : vector<8x8x128xf32> to vector<64x128xf32>
    %37 = arith.truncf %36 : vector<64x128xf32> to vector<64x128xbf16>
    %c3 = arith.constant 3 : index
    %c0_19 = arith.constant 0 : index
    %c0_20 = arith.constant 0 : index
    %38 = vector.load %arg4[%c3, %c0_19, %c0_20] : memref<9x128x128xbf16, #tpu.memory_space<vmem>>, vector<1x128x128xbf16>
    %39 = vector.shape_cast %38 : vector<1x128x128xbf16> to vector<128x128xbf16>
    %cst_21 = arith.constant dense<0.000000e+00> : vector<64x128xf32>
    %40 = tpu.matmul %37, %39, %cst_21 {dimension_numbers = #tpu.dot_dimension_numbers<[1], [0], [0], [1], [0, 0, 1, 1], [], []>} : vector<64x128xbf16>, vector<128x128xbf16>, vector<64x128xf32> -> vector<64x128xf32>
    %41 = arith.addf %34, %40 : vector<64x128xf32>
    %42 = vector.extract_strided_slice %14 {offsets = [1, 1, 0], sizes = [8, 8, 128], strides = [1, 1, 1]} : vector<10x10x128xf32> to vector<8x8x128xf32>
    %43 = vector.shape_cast %42 : vector<8x8x128xf32> to vector<64x128xf32>
    %44 = arith.truncf %43 : vector<64x128xf32> to vector<64x128xbf16>
    %c4 = arith.constant 4 : index
    %c0_22 = arith.constant 0 : index
    %c0_23 = arith.constant 0 : index
    %45 = vector.load %arg4[%c4, %c0_22, %c0_23] : memref<9x128x128xbf16, #tpu.memory_space<vmem>>, vector<1x128x128xbf16>
    %46 = vector.shape_cast %45 : vector<1x128x128xbf16> to vector<128x128xbf16>
    %cst_24 = arith.constant dense<0.000000e+00> : vector<64x128xf32>
    %47 = tpu.matmul %44, %46, %cst_24 {dimension_numbers = #tpu.dot_dimension_numbers<[1], [0], [0], [1], [0, 0, 1, 1], [], []>} : vector<64x128xbf16>, vector<128x128xbf16>, vector<64x128xf32> -> vector<64x128xf32>
    %48 = arith.addf %41, %47 : vector<64x128xf32>
    %49 = vector.extract_strided_slice %14 {offsets = [1, 2, 0], sizes = [8, 8, 128], strides = [1, 1, 1]} : vector<10x10x128xf32> to vector<8x8x128xf32>
    %50 = vector.shape_cast %49 : vector<8x8x128xf32> to vector<64x128xf32>
    %51 = arith.truncf %50 : vector<64x128xf32> to vector<64x128xbf16>
    %c5 = arith.constant 5 : index
    %c0_25 = arith.constant 0 : index
    %c0_26 = arith.constant 0 : index
    %52 = vector.load %arg4[%c5, %c0_25, %c0_26] : memref<9x128x128xbf16, #tpu.memory_space<vmem>>, vector<1x128x128xbf16>
    %53 = vector.shape_cast %52 : vector<1x128x128xbf16> to vector<128x128xbf16>
    %cst_27 = arith.constant dense<0.000000e+00> : vector<64x128xf32>
    %54 = tpu.matmul %51, %53, %cst_27 {dimension_numbers = #tpu.dot_dimension_numbers<[1], [0], [0], [1], [0, 0, 1, 1], [], []>} : vector<64x128xbf16>, vector<128x128xbf16>, vector<64x128xf32> -> vector<64x128xf32>
    %55 = arith.addf %48, %54 : vector<64x128xf32>
    %56 = vector.extract_strided_slice %14 {offsets = [2, 0, 0], sizes = [8, 8, 128], strides = [1, 1, 1]} : vector<10x10x128xf32> to vector<8x8x128xf32>
    %57 = vector.shape_cast %56 : vector<8x8x128xf32> to vector<64x128xf32>
    %58 = arith.truncf %57 : vector<64x128xf32> to vector<64x128xbf16>
    %c6 = arith.constant 6 : index
    %c0_28 = arith.constant 0 : index
    %c0_29 = arith.constant 0 : index
    %59 = vector.load %arg4[%c6, %c0_28, %c0_29] : memref<9x128x128xbf16, #tpu.memory_space<vmem>>, vector<1x128x128xbf16>
    %60 = vector.shape_cast %59 : vector<1x128x128xbf16> to vector<128x128xbf16>
    %cst_30 = arith.constant dense<0.000000e+00> : vector<64x128xf32>
    %61 = tpu.matmul %58, %60, %cst_30 {dimension_numbers = #tpu.dot_dimension_numbers<[1], [0], [0], [1], [0, 0, 1, 1], [], []>} : vector<64x128xbf16>, vector<128x128xbf16>, vector<64x128xf32> -> vector<64x128xf32>
    %62 = arith.addf %55, %61 : vector<64x128xf32>
    %63 = vector.extract_strided_slice %14 {offsets = [2, 1, 0], sizes = [8, 8, 128], strides = [1, 1, 1]} : vector<10x10x128xf32> to vector<8x8x128xf32>
    %64 = vector.shape_cast %63 : vector<8x8x128xf32> to vector<64x128xf32>
    %65 = arith.truncf %64 : vector<64x128xf32> to vector<64x128xbf16>
    %c7 = arith.constant 7 : index
    %c0_31 = arith.constant 0 : index
    %c0_32 = arith.constant 0 : index
    %66 = vector.load %arg4[%c7, %c0_31, %c0_32] : memref<9x128x128xbf16, #tpu.memory_space<vmem>>, vector<1x128x128xbf16>
    %67 = vector.shape_cast %66 : vector<1x128x128xbf16> to vector<128x128xbf16>
    %cst_33 = arith.constant dense<0.000000e+00> : vector<64x128xf32>
    %68 = tpu.matmul %65, %67, %cst_33 {dimension_numbers = #tpu.dot_dimension_numbers<[1], [0], [0], [1], [0, 0, 1, 1], [], []>} : vector<64x128xbf16>, vector<128x128xbf16>, vector<64x128xf32> -> vector<64x128xf32>
    %69 = arith.addf %62, %68 : vector<64x128xf32>
    %70 = vector.extract_strided_slice %14 {offsets = [2, 2, 0], sizes = [8, 8, 128], strides = [1, 1, 1]} : vector<10x10x128xf32> to vector<8x8x128xf32>
    %71 = vector.shape_cast %70 : vector<8x8x128xf32> to vector<64x128xf32>
    %72 = arith.truncf %71 : vector<64x128xf32> to vector<64x128xbf16>
    %c8 = arith.constant 8 : index
    %c0_34 = arith.constant 0 : index
    %c0_35 = arith.constant 0 : index
    %73 = vector.load %arg4[%c8, %c0_34, %c0_35] : memref<9x128x128xbf16, #tpu.memory_space<vmem>>, vector<1x128x128xbf16>
    %74 = vector.shape_cast %73 : vector<1x128x128xbf16> to vector<128x128xbf16>
    %cst_36 = arith.constant dense<0.000000e+00> : vector<64x128xf32>
    %75 = tpu.matmul %72, %74, %cst_36 {dimension_numbers = #tpu.dot_dimension_numbers<[1], [0], [0], [1], [0, 0, 1, 1], [], []>} : vector<64x128xbf16>, vector<128x128xbf16>, vector<64x128xf32> -> vector<64x128xf32>
    %76 = arith.addf %69, %75 : vector<64x128xf32>
    %c0_37 = arith.constant 0 : index
    %c0_38 = arith.constant 0 : index
    %77 = vector.load %arg5[%c0_37, %c0_38] : memref<1x128xf32, #tpu.memory_space<vmem>>, vector<1x128xf32>
    %78 = vector.broadcast %77 : vector<1x128xf32> to vector<64x128xf32>
    %79 = arith.addf %76, %78 : vector<64x128xf32>
    %cst_39 = arith.constant 0.000000e+00 : f32
    %80 = vector.broadcast %cst_39 : f32 to vector<64x128xf32>
    %81 = arith.maximumf %79, %80 : vector<64x128xf32>
    %82 = arith.truncf %81 : vector<64x128xf32> to vector<64x128xbf16>
    %c0_40 = arith.constant 0 : index
    %c0_41 = arith.constant 0 : index
    %83 = vector.load %arg6[%c0_40, %c0_41] : memref<128x128xbf16, #tpu.memory_space<vmem>>, vector<128x128xbf16>
    %cst_42 = arith.constant dense<0.000000e+00> : vector<64x128xf32>
    %84 = tpu.matmul %82, %83, %cst_42 {dimension_numbers = #tpu.dot_dimension_numbers<[1], [0], [0], [1], [0, 0, 1, 1], [], []>} : vector<64x128xbf16>, vector<128x128xbf16>, vector<64x128xf32> -> vector<64x128xf32>
    %c0_43 = arith.constant 0 : index
    %c0_44 = arith.constant 0 : index
    %85 = vector.load %arg7[%c0_43, %c0_44] : memref<1x128xf32, #tpu.memory_space<vmem>>, vector<1x128xf32>
    %86 = vector.broadcast %85 : vector<1x128xf32> to vector<64x128xf32>
    %87 = arith.addf %84, %86 : vector<64x128xf32>
    %88 = arith.addf %87, %9 : vector<64x128xf32>
    %cst_45 = arith.constant 0.000000e+00 : f32
    %89 = vector.broadcast %cst_45 : f32 to vector<64x128xf32>
    %90 = arith.maximumf %88, %89 : vector<64x128xf32>
    %91 = arith.truncf %90 : vector<64x128xf32> to vector<64x128xbf16>
    %c0_46 = arith.constant 0 : index
    %c0_47 = arith.constant 0 : index
    %c0_48 = arith.constant 0 : index
    %92 = vector.load %arg8[%c0_46, %c0_47, %c0_48] : memref<1x64x128xbf16, #tpu.memory_space<vmem>>, vector<1x64x128xbf16>
    %93 = vector.shape_cast %92 : vector<1x64x128xbf16> to vector<64x128xbf16>
    %94 = vector.shape_cast %91 : vector<64x128xbf16> to vector<1x64x128xbf16>
    tpu.vector_store %arg8[%c0_46, %c0_47, %c0_48], %94 {strides = array<i32>} : memref<1x64x128xbf16, #tpu.memory_space<vmem>>, vector<1x64x128xbf16>,
    return
  }
  func.func @transform_0(%arg0: i32) -> (i32, i32, i32) {
    %c0_i32 = arith.constant 0 : i32
    %c0_i32_0 = arith.constant 0 : i32
    %c0_i32_1 = arith.constant 0 : i32
    return %arg0, %c0_i32, %c0_i32_0 : i32, i32, i32
  }
  func.func @transform_1(%arg0: i32) -> (i32, i32) {
    %c0_i32 = arith.constant 0 : i32
    %c0_i32_0 = arith.constant 0 : i32
    %c0_i32_1 = arith.constant 0 : i32
    return %c0_i32, %c0_i32_0 : i32, i32
  }
  func.func @transform_2(%arg0: i32) -> (i32, i32) {
    %c0_i32 = arith.constant 0 : i32
    %c0_i32_0 = arith.constant 0 : i32
    %c0_i32_1 = arith.constant 0 : i32
    return %c0_i32, %c0_i32_0 : i32, i32
  }
  func.func @transform_3(%arg0: i32) -> (i32, i32, i32) {
    %c0_i32 = arith.constant 0 : i32
    %c0_i32_0 = arith.constant 0 : i32
    %c0_i32_1 = arith.constant 0 : i32
    %c0_i32_2 = arith.constant 0 : i32
    return %c0_i32, %c0_i32_0, %c0_i32_1 : i32, i32, i32
  }
  func.func @transform_4(%arg0: i32) -> (i32, i32) {
    %c0_i32 = arith.constant 0 : i32
    %c0_i32_0 = arith.constant 0 : i32
    %c0_i32_1 = arith.constant 0 : i32
    return %c0_i32, %c0_i32_0 : i32, i32
  }
  func.func @transform_5(%arg0: i32) -> (i32, i32) {
    %c0_i32 = arith.constant 0 : i32
    %c0_i32_0 = arith.constant 0 : i32
    %c0_i32_1 = arith.constant 0 : i32
    return %c0_i32, %c0_i32_0 : i32, i32
  }
  func.func @transform_6(%arg0: i32) -> (i32, i32) {
    %c0_i32 = arith.constant 0 : i32
    %c0_i32_0 = arith.constant 0 : i32
    %c0_i32_1 = arith.constant 0 : i32
    return %c0_i32, %c0_i32_0 : i32, i32
  }
  func.func @transform_7(%arg0: i32) -> (i32, i32, i32) {
    %c0_i32 = arith.constant 0 : i32
    %c0_i32_0 = arith.constant 0 : i32
    %c0_i32_1 = arith.constant 0 : i32
    return %arg0, %c0_i32, %c0_i32_0 : i32, i32, i32
  }
}

</mosaic_0001>

<bundles_post_ra>
// kernel: _lambda_.2
= control target key start
LH: loop header
LB: loop body
LE: loop exit
PB: predicated region body
PF: predicated region fallthrough
CT: control target
= control target key end

     0   :  { %s3044_s24 = smov 0   ;;  %s3725_s0 = inlined_call_operand.vmem [shape: bf16[2,64,128], index: 0, kind: input, shape index: {}]   ;;  %s3726_s1 = inlined_call_operand.vmem [shape: bf16[128,256], index: 1, kind: input, shape index: {}]   ;;  %s3727_s2 = inlined_call_operand.vmem [shape: f32[1,256], index: 2, kind: input, shape index: {}]   ;;  %s3728_s3 = inlined_call_operand.vmem [shape: bf16[9,128,128], index: 3, kind: input, shape index: {}]   ;;  %s3729_s4 = inlined_call_operand.vmem [shape: f32[1,128], index: 4, kind: input, shape index: {}, may-alias: {4,6}]   ;;  %s3730_s5 = inlined_call_operand.vmem [shape: bf16[128,128], index: 5, kind: input, shape index: {}]   ;;  %s3731_s6 = inlined_call_operand.vmem [shape: f32[1,128], index: 6, kind: input, shape index: {}, may-alias: {4,6}]   ;;  %s3732_s7 = inlined_call_operand.vmem [shape: bf16[2,64,128], index: 7, kind: output, shape index: {}]  }
   0x1 LB: > { %s2157_s25 = sadd.s32 4294967295, %s2999_s24   ;;  %p2161_p0 = scmp.ge.s32.totalorder %s2999_s24, 1  ;;  %s2999_s24 = sphi %s3044_s24, %s17_s24  }
   0x2   : > { %p237_p1 = scmp.lt.s32.totalorder %s2999_s24, 3 }
   0x4   : > { %p238_p2 = pnand %p2161_p0, %p237_p1 }
   0x6   : > { %241 = sbr.rel (%p238_p2) target bundleno = 810 (0x32a), region = 48 }
   0xb   : > { %v2884_v0 = vld [vmem:[%s3726_s1 + $0x74] ss:$8 sps:$4 sm:$0xff]   ;;  %p269_p3 = scmp.lt.s32.totalorder %s2157_s25, 1  ;;  %v2886_v1 = vld [vmem:[%s3726_s1 + $0x70] ss:$8 sps:$4 sm:$0xff]   ;;  %v3001_v2 = vmov 0   ;;  %v306_v39 = vlaneseq }
   0xc   : > { %452 = vmatprep.mubr.bf16.mxu0 %v3001_v2  ;;  %420 = vmatprep.subr.bf16.mxu0 %v2884_v0  ;;  %v2887_v3 = vld [vmem:[%s3726_s1 + $0x64] ss:$8 sps:$4 sm:$0xff]   ;;  %v2889_v4 = vld [vmem:[%s3726_s1 + $0x60] ss:$8 sps:$4 sm:$0xff]   ;;  %v2890_v5 = vld [vmem:[%s3726_s1 + $0x54] ss:$8 sps:$4 sm:$0xff]  }
   0xd   : > { %s3769_s25 = smov (!%p269_p3, %s2157_s25), 1  ;;  %421 = vmatpush1.bf16.msra.mxu0 %v2886_v1  ;;  %v2892_v6 = vld [vmem:[%s3726_s1 + $0x50] ss:$8 sps:$4 sm:$0xff]   ;;  %v2893_v7 = vld [vmem:[%s3726_s1 + $0x44] ss:$8 sps:$4 sm:$0xff]   ;;  %v3175_v40 = vshrl.u32 %v306_v39, 7 }
   0xe   : > { %422 = vmatprep.subr.bf16.mxu0 %v2887_v3  ;;  %s2464_s13 = sshll.u32 %s3769_s25, 5  ;;  %v2895_v8 = vld [vmem:[%s3726_s1 + $0x40] ss:$8 sps:$4 sm:$0xff]   ;;  %v2896_v9 = vld [vmem:[%s3726_s1 + $0x34] ss:$8 sps:$4 sm:$0xff]   ;;  %vm525_vm0 = vcmask 1040384  }
   0xf   : > { %s3082_s20 = scalar_lea.vmem %s3725_s0, %s2464_s13  ;;  %v2898_v10 = vld [vmem:[%s3726_s1 + $0x30] ss:$8 sps:$4 sm:$0xff]   ;;  %v2899_v11 = vld [vmem:[%s3726_s1 + $0x24] ss:$8 sps:$4 sm:$0xff]   ;;  %v2901_v13 = vld [vmem:[%s3726_s1 + $0x20] ss:$8 sps:$4 sm:$0xff]   ;;  %s278_s9 = scalar_lea.vmem %s3732_s7, %s2464_s13 }
  0x10   : > { %v2913_v12 = vld [vmem:[%s3728_s3 + $0x78] sm:$0xff]   ;;  %v2915_v14 = vld [vmem:[%s3728_s3 + $0x70] sm:$0xff]   ;;  %v2917_v16 = vld [vmem:[%s3728_s3 + $0x68] sm:$0xff]   ;;  %3734 = vst [vmem:[#allocation2_spill] sm:$0xff] %v3175_v40  ;;  %v308_v41 = vsub.s32 0, %v3175_v40  ;;  %vm3002_vm2 = vmmov 1  }
  0x11   : > { %423 = vmatpush1.bf16.msra.mxu0 %v2889_v4  ;;  %2617 = vmatprep.subr.bf16.mxu1 %v2913_v12  ;;  %v2902_v15 = vld [vmem:[%s3726_s1 + $0x14] ss:$8 sps:$4 sm:$0xff]   ;;  %v2904_v17 = vld [vmem:[%s3726_s1 + $0x10] ss:$8 sps:$4 sm:$0xff]   ;;  %v2905_v18 = vld [vmem:[%s3726_s1 + $0x4] ss:$8 sps:$4 sm:$0xff]  }
  0x12   : > { %424 = vmatprep.subr.bf16.mxu0 %v2890_v5  ;;  %2618 = vmatpush3.bf16.msra.mxu1 %v2913_v12  ;;  %v2907_v19 = vld [vmem:[%s3726_s1] ss:$8 sps:$4 sm:$0xff]   ;;  %v2912_v20 = vld [vmem:[%s3728_s3 + $0x38] sm:$0xff]   ;;  %v2914_v22 = vld [vmem:[%s3728_s3 + $0x30] sm:$0xff]   ;;  %v3003_v54 = vmov 0.0   ;;  %vm577_vm4 = vcmask 1046528  }
  0x13   : > { %2619 = vmatprep.subr.bf16.mxu1 %v2915_v14  ;;  %v2908_v21 = vld [vmem:[%s3082_s20] sm:$0xff]   ;;  %v2916_v23 = vld [vmem:[%s3728_s3 + $0x28] sm:$0xff]   ;;  %v2910_v26 = vld [vmem:[%s3082_s20 + $0x10] sm:$0xff]   ;;  %v3214_v62 = vrot.slane %v3003_v54, 1  ;;  %vm856_vm6 = vcmask 1045504  }
  0x14   : > { %v2909_v24 = vld [vmem:[%s3082_s20 + $0x8] sm:$0xff]   ;;  %v2918_v25 = vld [vmem:[%s3728_s3 + $0x20] sm:$0xff]   ;;  %v2911_v27 = vld [vmem:[%s3082_s20 + $0x18] sm:$0xff]  }
  0x15   : > { %425 = vmatpush1.bf16.msra.mxu0 %v2892_v6  ;;  %v2919_v28 = vld [vmem:[%s3728_s3 + $0x60] sm:$0xff]   ;;  %v2920_v29 = vld [vmem:[%s3728_s3 + $0x18] sm:$0xff]   ;;  %v2922_v31 = vld [vmem:[%s3728_s3 + $0x10] sm:$0xff]  }
  0x16   : > { %426 = vmatprep.subr.bf16.mxu0 %v2893_v7  ;;  %2620 = vmatpush3.bf16.msra.mxu1 %v2915_v14  ;;  %v2921_v30 = vld [vmem:[%s3728_s3 + $0x58] sm:$0xff]   ;;  %v2923_v32 = vld [vmem:[%s3728_s3 + $0x50] sm:$0xff]   ;;  %v2924_v33 = vld [vmem:[%s3728_s3 + $0x8] sm:$0xff]  }
  0x17   : > { %2621 = vmatprep.subr.bf16.mxu1 %v2917_v16  ;;  %v2925_v34 = vld [vmem:[%s3728_s3 + $0x48] sm:$0xff]   ;;  %v2926_v35 = vld [vmem:[%s3728_s3] sm:$0xff]   ;;  %v2928_v37 = vld [vmem:[%s3728_s3 + $0xf8] sm:$0xff]  }
  0x18   : > { %v2927_v36 = vld [vmem:[%s3728_s3 + $0x40] sm:$0xff]   ;;  %v3172_v38 = vld [vmem:[%s3728_s3 + $0xb8] sm:$0xff]   ;;  %vm3187_vm1 = vmneg %vm525_vm0 }
  0x19   : > { %427 = vmatpush1.bf16.msra.mxu0 %v2895_v8  ;;  %v304_v42 = vld [vmem:[%s3727_s2] sm:$0x3]  ;;  %vm2219_vm3 = vmpackc.low %vm3187_vm1, %vm3002_vm2  ;;  %v2981_v48 = vld [vmem:[%s3728_s3 + $0x210] sm:$0xff]  }
  0x1a   : > { %428 = vmatprep.subr.bf16.mxu0 %v2896_v9  ;;  %2622 = vmatpush3.bf16.msra.mxu1 %v2917_v16  ;;  %v3181_v43 = vrot.slane %v304_v42, %v308_v41  ;;  %vm3238_vm5 = vmpackc.low %vm3187_vm1, %vm3187_vm1  ;;  %v2934_v42 = vld [vmem:[%s3728_s3 + $0xe0] sm:$0xff]  }
  0x1b   : > { %2623 = vmatprep.subr.bf16.mxu1 %v2919_v28  ;;  %vm2393_vm7 = vmpackc.low %vm3002_vm2, %vm3187_vm1  ;;  %v2979_v9 = vld [vmem:[%s3728_s3 + $0x220] sm:$0xff]  }
  0x1d   : > { %429 = vmatpush1.bf16.msra.mxu0 %v2898_v10 }
  0x1e   : > { %430 = vmatprep.subr.bf16.mxu0 %v2899_v11  ;;  %2624 = vmatpush3.bf16.msra.mxu1 %v2919_v28 }
  0x1f   : > { %2625 = vmatprep.subr.bf16.mxu1 %v2921_v30 }
  0x21   : > { %431 = vmatpush1.bf16.msra.mxu0 %v2901_v13 }
  0x22   : > { %432 = vmatprep.subr.bf16.mxu0 %v2902_v15  ;;  %2626 = vmatpush3.bf16.msra.mxu1 %v2921_v30  ;;  %v2930_v15 = vld [vmem:[%s3728_s3 + $0xf0] sm:$0xff]  }
  0x23   : > { %2627 = vmatprep.subr.bf16.mxu1 %v2923_v32 }
  0x25   : > { %433 = vmatpush1.bf16.msra.mxu0 %v2904_v17 }
  0x26   : > { %434 = vmatprep.subr.bf16.mxu0 %v2905_v18  ;;  %2628 = vmatpush3.bf16.msra.mxu1 %v2923_v32 }
  0x27   : > { %2629 = vmatprep.subr.bf16.mxu1 %v2925_v34 }
  0x29   : > { %435 = vmatpush1.bf16.msra.mxu0 %v2907_v19 }
  0x2a   : > { %2641 = vmatprep.subr.bf16.mxu0 %v2912_v20  ;;  %2630 = vmatpush3.bf16.msra.mxu1 %v2925_v34  ;;  %v2931_v34 = vld [vmem:[%s3728_s3 + $0xb0] sm:$0xff]  }
  0x2b   : > { %2631 = vmatprep.subr.bf16.mxu1 %v2927_v36 }
  0x2c   : > { %453 = vmatmul.mubr.bf16.vlgmr.msra.gmra.mxu0 %v2908_v21 }
  0x2d   : > { %462 = vmatprep.mubr.bf16.mxu0 %v3001_v2  ;;  %2642 = vmatpush3.bf16.msra.mxu0 %v2912_v20 }
  0x2e   : > { %2643 = vmatprep.subr.bf16.mxu0 %v2914_v22  ;;  %2632 = vmatpush3.bf16.msra.mxu1 %v2927_v36 }
  0x2f   : > { %2665 = vmatprep.subr.bf16.mxu1 %v3172_v38 }
  0x31   : > { %2644 = vmatpush3.bf16.msra.mxu0 %v2914_v22 }
  0x32   : > { %2645 = vmatprep.subr.bf16.mxu0 %v2916_v23 }
  0x34   : > { %463 = vmatmul.mubr.bf16.gmra.mxu0 %v2909_v24 }
  0x35   : > { %472 = vmatprep.mubr.bf16.mxu0 %v3001_v2  ;;  %2646 = vmatpush3.bf16.msra.mxu0 %v2916_v23 }
  0x36   : > { %2647 = vmatprep.subr.bf16.mxu0 %v2918_v25 }
  0x39   : > { %2648 = vmatpush3.bf16.msra.mxu0 %v2918_v25 }
  0x3a   : > { %2649 = vmatprep.subr.bf16.mxu0 %v2920_v29 }
  0x3c   : > { %473 = vmatmul.mubr.bf16.gmra.mxu0 %v2910_v26  ;;  %v2932_v26 = vld [vmem:[%s3728_s3 + $0xe8] sm:$0xff]  }
  0x3d   : > { %482 = vmatprep.mubr.bf16.mxu0 %v3001_v2  ;;  %2650 = vmatpush3.bf16.msra.mxu0 %v2920_v29 }
  0x3e   : > { %2651 = vmatprep.subr.bf16.mxu0 %v2922_v31 }
  0x41   : > { %2652 = vmatpush3.bf16.msra.mxu0 %v2922_v31 }
  0x42   : > { %2653 = vmatprep.subr.bf16.mxu0 %v2924_v33 }
  0x44   : > { %483 = vmatmul.mubr.bf16.gmra.mxu0 %v2911_v27 }
  0x45   : > { %2654 = vmatpush3.bf16.msra.mxu0 %v2924_v33 }
  0x46   : > { %2655 = vmatprep.subr.bf16.mxu0 %v2926_v35 }
  0x49   : > { %2656 = vmatpush3.bf16.msra.mxu0 %v2926_v35 }
  0x4a   : > { %2689 = vmatprep.subr.bf16.mxu0 %v2928_v37 }
  0xec   : > { %v454_v44 = vpop.f32.mrf.mxu0 }
  0xed   : > { %v455_v45 = vadd.f32 %v454_v44, %v3181_v43 }
  0xee   : > { %v3184_v46 = vpop.f32.mrf.mxu0 }
  0xef   : > { %3735 = vst [vmem:[#allocation3_spill] sm:$0xff] %v3184_v46  ;;  %v493_v47 = vmax.f32 %v455_v45, 0.0 }
  0xf0   : > { %v458_v49 = vpop.f32.mrf.mxu0 }
  0xf1   : > { %v3191_v50 = vrot.slane %v493_v47, 7  ;;  %v459_v51 = vadd.f32 %v458_v49, %v3181_v43 }
  0xf2   : > { %v3194_v52 = vpop.f32.mrf.mxu0 }
  0xf3   : > { %3738 = vst [vmem:[#allocation4_spill] sm:$0xff] %v3194_v52  ;;  %v494_v53 = vmax.f32 %v459_v51, 0.0  ;;  %v2220_v55 = vpack.c.bf16 %v3191_v50, %v3003_v54  ;;  %v3203_v56 = vsel %vm525_vm0, 0.0, %v3191_v50  ;;  %v3207_v58 = vsel %vm525_vm0, %v3191_v50, 0.0 }
  0xf4   : > { %v464_v57 = vpop.f32.mrf.mxu0  ;;  %v580_v59 = vrot.slane %v3203_v56, 1  ;;  %v581_v63 = vrot.slane %v3207_v58, 1 }
  0xf5   : > { %v3210_v60 = vrot.slane %v494_v53, 7  ;;  %v465_v61 = vadd.f32 %v464_v57, %v3181_v43  ;;  %2657 = vmatprep.mubr.msk.bf16.mxu0 %vm2219_vm3, %v2220_v55  ;;  %v2933_v57 = vld [vmem:[%s3728_s3 + $0xa8] sm:$0xff]  }
  0xf6   : > { %v3217_v0 = vpop.f32.mrf.mxu0  ;;  %v3224_v4 = vsel %vm577_vm4, %v580_v59, %v581_v63 }
  0xf7   : > { %3739 = vst [vmem:[#allocation5_spill] sm:$0xff] %v3217_v0  ;;  %v495_v1 = vmax.f32 %v465_v61, 0.0  ;;  %v3221_v3 = vsel %vm525_vm0, 0.0, %v3210_v60  ;;  %v3231_v7 = vsel %vm525_vm0, %v3210_v60, 0.0  ;;  %v609_v8 = vpack.c.bf16 %v3224_v4, %v3214_v62 }
  0xf8   : > { %v468_v2 = vpop.f32.mrf.mxu0  ;;  %v583_v16 = vrot.slane %v3221_v3, 1  ;;  %v584_v17 = vrot.slane %v3231_v7, 1 }
  0xf9   : > { %v3226_v5 = vrot.slane %v495_v1, 7  ;;  %v469_v6 = vadd.f32 %v468_v2, %v3181_v43  ;;  %2633 = vmatprep.mubr.bf16.mxu1 %v609_v8 }
  0xfa   : > { %v3242_v10 = vpop.f32.mrf.mxu0  ;;  %v3283_v28 = vsel %vm577_vm4, %v583_v16, %v584_v17  ;;  %v859_v17 = vrot.slane %v3203_v56, 2 }
  0xfb   : > { %3742 = vst [vmem:[#allocation6_spill] sm:$0xff] %v3242_v10  ;;  %v3246_v11 = vsel %vm525_vm0, 0.0, %v3226_v5  ;;  %v3250_v12 = vsel %vm525_vm0, %v3226_v5, 0.0  ;;  %v3254_v13 = vpack.c.bf16 %v3226_v5, %v3210_v60  ;;  %v496_v14 = vmax.f32 %v469_v6, 0.0  ;;  %v2936_v6 = vld [vmem:[%s3728_s3 + $0xd8] sm:$0xff]  }
  0xfc   : > { %v474_v18 = vpop.f32.mrf.mxu0  ;;  %v586_v21 = vrot.slane %v3246_v11, 1  ;;  %v587_v22 = vrot.slane %v3250_v12, 1 }
  0xfd   : > { %v3261_v19 = vrot.slane %v496_v14, 7  ;;  %v475_v20 = vadd.f32 %v474_v18, %v3181_v43  ;;  %2658 = vmatmul.mubr.msk.bf16.vlgmr.msra.gmra.mxu0 %vm3238_vm5, %v3254_v13  ;;  %v860_v18 = vrot.slane %v3207_v58, 2 }
  0xfe   : > { %2690 = vmatpush3.bf16.msra.mxu0 %v2928_v37  ;;  %v3269_v23 = vpop.f32.mrf.mxu0  ;;  %v3286_v30 = vsel %vm577_vm4, %v586_v21, %v587_v22  ;;  %v2935_v22 = vld [vmem:[%s3728_s3 + $0xa0] sm:$0xff]  }
  0xff   : > { %3743 = vst [vmem:[#allocation7_spill] sm:$0xff] %v3269_v23  ;;  %v3273_v24 = vsel %vm525_vm0, 0.0, %v3261_v19  ;;  %v497_v25 = vmax.f32 %v475_v20, 0.0  ;;  %2691 = vmatprep.subr.bf16.mxu0 %v2930_v15  ;;  %v3280_v27 = vsel %vm525_vm0, %v3261_v19, 0.0  ;;  %v3293_v33 = vpack.c.bf16 %v3286_v30, %v3283_v28 }
 0x100   : > { %v478_v29 = vpop.f32.mrf.mxu0  ;;  %v589_v36 = vrot.slane %v3273_v24, 1  ;;  %v590_v44 = vrot.slane %v3280_v27, 1 }
 0x101   : > { %v3288_v31 = vrot.slane %v497_v25, 7  ;;  %v479_v32 = vadd.f32 %v478_v29, %v3181_v43  ;;  %2634 = vmatmul.mubr.bf16.vlgmr.msra.gmra.mxu1 %v3293_v33  ;;  %v2938_v29 = vld [vmem:[%s3728_s3 + $0xd0] sm:$0xff]  }
 0x102   : > { %2692 = vmatpush3.bf16.msra.mxu0 %v2930_v15  ;;  %v3298_v35 = vpop.f32.mrf.mxu0  ;;  %2666 = vmatpush3.bf16.msra.mxu1 %v3172_v38  ;;  %v3344_v2 = vsel %vm577_vm4, %v589_v36, %v590_v44  ;;  %v2937_v44 = vld [vmem:[%s3728_s3 + $0x98] sm:$0xff]  }
 0x103   : > { %3744 = vst [vmem:[#allocation8_spill] sm:$0xff] %v3298_v35  ;;  %v3303_v37 = vsel %vm525_vm0, 0.0, %v3288_v31  ;;  %v3307_v39 = vsel %vm525_vm0, %v3288_v31, 0.0  ;;  %v498_v41 = vmax.f32 %v479_v32, 0.0  ;;  %2693 = vmatprep.subr.bf16.mxu0 %v2932_v26  ;;  %v3317_v47 = vpack.c.bf16 %v3288_v31, %v3261_v19  ;;  %2667 = vmatprep.subr.bf16.mxu1 %v2931_v34 }
 0x104   : > { %v484_v45 = vpop.f32.mrf.mxu0  ;;  %v592_v49 = vrot.slane %v3303_v37, 1  ;;  %v593_v51 = vrot.slane %v3307_v39, 1 }
 0x105   : > { %v3321_v53 = vrot.slane %v498_v41, 7  ;;  %v485_v55 = vadd.f32 %v484_v45, %v3181_v43  ;;  %2661 = vmatprep.mubr.msk.bf16.mxu0 %vm3238_vm5, %v3317_v47  ;;  %v3395_v45 = vsel %vm856_vm6, %v859_v17, %v860_v18 }
 0x106   : > { %2694 = vmatpush3.bf16.msra.mxu0 %v2932_v26  ;;  %v3330_v38 = vpop.f32.mrf.mxu0  ;;  %v3333_v59 = vsel %vm577_vm4, %v592_v49, %v593_v51  ;;  %2668 = vmatpush3.bf16.msra.mxu1 %v2931_v34 }
 0x107   : > { %3745 = vst [vmem:[#allocation9_spill] sm:$0xff] %v3330_v38  ;;  %v3337_v61 = vsel %vm525_vm0, 0.0, %v3321_v53  ;;  %v3341_v63 = vsel %vm525_vm0, %v3321_v53, 0.0  ;;  %v499_v1 = vmax.f32 %v485_v55, 0.0  ;;  %2695 = vmatprep.subr.bf16.mxu0 %v2934_v42  ;;  %v3351_v8 = vpack.c.bf16 %v3333_v59, %v3344_v2  ;;  %2669 = vmatprep.subr.bf16.mxu1 %v2933_v57 }
 0x108   : > { %v488_v14 = vpop.f32.mrf.mxu0  ;;  %v595_v15 = vrot.slane %v3337_v61, 1  ;;  %v596_v16 = vrot.slane %v3341_v63, 1 }
 0x109   : > { %v3357_v20 = vrot.slane %v499_v1, 7  ;;  %v489_v21 = vadd.f32 %v488_v14, %v3181_v43  ;;  %2637 = vmatprep.mubr.bf16.mxu1 %v3351_v8  ;;  %v3373_v43 = vrot.slane %v3003_v54, 2 }
 0x10a   : > { %2696 = vmatpush3.bf16.msra.mxu0 %v2934_v42  ;;  %2670 = vmatpush3.bf16.msra.mxu1 %v2933_v57  ;;  %v3383_v32 = vsel %vm577_vm4, %v595_v15, %v596_v16  ;;  %v2288_v42 = vpack.c.bf16 %v3210_v60, %v3191_v50  ;;  %v2940_v57 = vld [vmem:[%s3728_s3 + $0xc8] sm:$0xff]  }
 0x10b   : > { %v3366_v25 = vsel %vm525_vm0, 0.0, %v3357_v20  ;;  %v3370_v56 = vsel %vm525_vm0, %v3357_v20, 0.0  ;;  %v500_v58 = vmax.f32 %v489_v21, 0.0  ;;  %2697 = vmatprep.subr.bf16.mxu0 %v2936_v6  ;;  %v3377_v26 = vpack.c.bf16 %v3357_v20, %v3321_v53  ;;  %2671 = vmatprep.subr.bf16.mxu1 %v2935_v22 }
 0x10c   : > { %v598_v34 = vrot.slane %v3366_v25, 1  ;;  %v599_v36 = vrot.slane %v3370_v56, 1  ;;  %v888_v55 = vpack.c.bf16 %v3395_v45, %v3373_v43 }
 0x10d   : > { %v3387_v41 = vrot.slane %v500_v58, 7  ;;  %2662 = vmatmul.mubr.msk.bf16.gmra.mxu0 %vm3238_vm5, %v3377_v26 }
 0x10e   : > { %v3401_v49 = vsel %vm577_vm4, %v598_v34, %v599_v36  ;;  %2698 = vmatpush3.bf16.msra.mxu0 %v2936_v6  ;;  %2705 = vmatprep.mubr.msk.bf16.mxu0 %vm3238_vm5, %v2288_v42  ;;  %v2939_v6 = vld [vmem:[%s3728_s3 + $0x90] sm:$0xff]   ;;  %v2944_v34 = vld [vmem:[%s3728_s3 + $0x178] sm:$0xff]   ;;  %v2943_v36 = vld [vmem:[%s3728_s3 + $0x80] sm:$0xff]   ;;  %v865_v42 = vrot.slane %v3246_v11, 2 }
 0x10f   : > { %v533_v51 = vsel %vm525_vm0, 0.0, %v3387_v41  ;;  %v541_v50 = vsel %vm525_vm0, %v3387_v41, 0.0  ;;  %v3411_v60 = vpack.c.bf16 %v3401_v49, %v3383_v32  ;;  %2672 = vmatpush3.bf16.msra.mxu1 %v2935_v22  ;;  %2699 = vmatprep.subr.bf16.mxu0 %v2938_v29  ;;  %v2942_v22 = vld [vmem:[%s3728_s3 + $0xc0] sm:$0xff]   ;;  %v2946_v11 = vld [vmem:[%s3728_s3 + $0x170] sm:$0xff]  }
 0x110   : > { %v1320_v1 = vrot.slane %v533_v51, 2  ;;  %v1321_v14 = vrot.slane %v541_v50, 2  ;;  %v1174_v15 = vrot.slane %v533_v51, 1  ;;  %2673 = vmatprep.subr.bf16.mxu1 %v2937_v44  ;;  %v1175_v16 = vrot.slane %v541_v50, 1 }
 0x111   : > { %2638 = vmatmul.mubr.bf16.gmra.mxu1 %v3411_v60  ;;  %v871_v51 = vrot.slane %v3303_v37, 2  ;;  %v872_v50 = vrot.slane %v3307_v39, 2  ;;  %v2945_v37 = vld [vmem:[%s3728_s3 + $0x138] sm:$0xff]   ;;  %v2947_v39 = vld [vmem:[%s3728_s3 + $0x130] sm:$0xff]  }
 0x112   : > { %2681 = vmatprep.mubr.bf16.mxu1 %v888_v55  ;;  %v3423_v17 = vsel %vm856_vm6, %v1320_v1, %v1321_v14  ;;  %2700 = vmatpush3.bf16.msra.mxu0 %v2938_v29  ;;  %v3426_v18 = vsel %vm577_vm4, %v1174_v15, %v1175_v16  ;;  %v2941_v29 = vld [vmem:[%s3728_s3 + $0x88] sm:$0xff]   ;;  %v2293_v55 = vpack.c.bf16 %v3261_v19, %v3226_v5  ;;  %v863_v1 = vrot.slane %v3231_v7, 2 }
 0x113   : > { %v1744_v21 = vpack.c.bf16 %v3373_v43, %v3423_v17  ;;  %2674 = vmatpush3.bf16.msra.mxu1 %v2937_v44  ;;  %2701 = vmatprep.subr.bf16.mxu0 %v2940_v57  ;;  %v1605_v58 = vpack.c.bf16 %v3214_v62, %v3426_v18  ;;  %v866_v44 = vrot.slane %v3250_v12, 2  ;;  %v2298_v12 = vpack.c.bf16 %v3321_v53, %v3288_v31  ;;  %v2948_v53 = vld [vmem:[%s3728_s3 + $0x168] sm:$0xff]   ;;  %v2980_v62 = vld [vmem:[%s3728_s3 + $0x218] sm:$0xff]   ;;  %v2987_v43 = vld [vmem:[%s3730_s5 + $0x20] sm:$0xff]  }
 0x114   : > { %2675 = vmatprep.subr.bf16.mxu1 %v2939_v6  ;;  %v868_v5 = vrot.slane %v3273_v24, 2  ;;  %v3470_v19 = vsel %vm856_vm6, %v871_v51, %v872_v50  ;;  %v874_v14 = vrot.slane %v3337_v61, 2  ;;  %v877_v16 = vrot.slane %v3366_v25, 2  ;;  %v2950_v61 = vld [vmem:[%s3728_s3 + $0x160] sm:$0xff]   ;;  %v2949_v25 = vld [vmem:[%s3728_s3 + $0x128] sm:$0xff]   ;;  %v2953_v51 = vld [vmem:[%s3728_s3 + $0x118] sm:$0xff]  }
 0x115   : > { %v3465_v7 = vsel %vm856_vm6, %v865_v42, %v866_v44  ;;  %v1178_v42 = vpack.c.bf16 %v3283_v28, %v3224_v4  ;;  %v2954_v44 = vld [vmem:[%s3728_s3 + $0x150] sm:$0xff]   ;;  %v2956_v4 = vld [vmem:[%s3728_s3 + $0x148] sm:$0xff]   ;;  %v2958_v50 = vld [vmem:[%s3728_s3 + $0x140] sm:$0xff]  }
 0x116   : > { %2702 = vmatpush3.bf16.msra.mxu0 %v2940_v57  ;;  %v862_v57 = vrot.slane %v3221_v3, 2  ;;  %v869_v3 = vrot.slane %v3280_v27, 2  ;;  %v2955_v28 = vld [vmem:[%s3728_s3 + $0x110] sm:$0xff]  }
 0x117   : > { %2676 = vmatpush3.bf16.msra.mxu1 %v2939_v6  ;;  %2703 = vmatprep.subr.bf16.mxu0 %v2942_v22  ;;  %v875_v6 = vrot.slane %v3341_v63, 2 }
 0x118   : > { %2677 = vmatprep.subr.bf16.mxu1 %v2941_v29  ;;  %v864_v31 = vsel %vm856_vm6, %v862_v57, %v863_v1  ;;  %v3477_v27 = vsel %vm856_vm6, %v868_v5, %v869_v3  ;;  %v2960_v57 = vld [vmem:[%s3728_s3 + $0x1f8] sm:$0xff]   ;;  %v2959_v1 = vld [vmem:[%s3728_s3 + $0x100] sm:$0xff]   ;;  %v1179_v3 = vpack.c.bf16 %v3344_v2, %v3286_v30  ;;  %v2965_v2 = vld [vmem:[%s3728_s3 + $0x1a8] sm:$0xff]  }
 0x119   : > { %v3474_v24 = vpack.c.bf16 %v3465_v7, %v864_v31  ;;  %v3488_v15 = vpack.c.bf16 %v3470_v19, %v3477_v27  ;;  %v1324_v63 = vpack.c.bf16 %v864_v31, %v3395_v45  ;;  %v2951_v45 = vld [vmem:[%s3728_s3 + $0x120] sm:$0xff]   ;;  %v2961_v5 = vld [vmem:[%s3728_s3 + $0x1b8] sm:$0xff]   ;;  %v1180_v31 = vpack.c.bf16 %v3383_v32, %v3333_v59 }
 0x11a   : > { %2704 = vmatpush3.bf16.msra.mxu0 %v2942_v22  ;;  %v878_v22 = vrot.slane %v3370_v56, 2  ;;  %v876_v56 = vsel %vm856_vm6, %v874_v14, %v875_v6  ;;  %v2966_v30 = vld [vmem:[%s3728_s3 + $0x1e0] sm:$0xff]   ;;  %v1181_v59 = vpack.c.bf16 %v3426_v18, %v3401_v49  ;;  %v2969_v49 = vld [vmem:[%s3728_s3 + $0x198] sm:$0xff]   ;;  %v2973_v6 = vld [vmem:[%s3728_s3 + $0x188] sm:$0xff]  }
 0x11b   : > { %2678 = vmatpush3.bf16.msra.mxu1 %v2941_v29  ;;  %2737 = vmatprep.subr.bf16.mxu0 %v2944_v34  ;;  %v2303_v29 = vpack.c.bf16 %v3387_v41, %v3357_v20  ;;  %v2967_v32 = vld [vmem:[%s3728_s3 + $0x1a0] sm:$0xff]   ;;  %v2986_v18 = vld [vmem:[%s3730_s5 + $0x28] sm:$0xff]  }
 0x11c   : > { %2679 = vmatprep.subr.bf16.mxu1 %v2943_v36  ;;  %v2974_v14 = vld [vmem:[%s3728_s3 + $0x1c0] sm:$0xff]  }
 0x11d   : > { %2706 = vmatmul.mubr.msk.bf16.vlgmr.msra.gmra.mxu0 %vm3238_vm5, %v2293_v55  ;;  %v2957_v55 = vld [vmem:[%s3728_s3 + $0x108] sm:$0xff]  }
 0x11e   : > { %2709 = vmatprep.mubr.msk.bf16.mxu0 %vm3238_vm5, %v2298_v12  ;;  %2738 = vmatpush3.bf16.msra.mxu0 %v2944_v34  ;;  %v3508_v34 = vsel %vm856_vm6, %v877_v16, %v878_v22  ;;  %v2962_v12 = vld [vmem:[%s3728_s3 + $0x1f0] sm:$0xff]   ;;  %v2975_v16 = vld [vmem:[%s3728_s3 + $0x180] sm:$0xff]   ;;  %v2976_v22 = vld [vmem:[%s3728_s3 + $0x238] sm:$0xff]  }
 0x11f   : > { %2680 = vmatpush3.bf16.msra.mxu1 %v2943_v36  ;;  %2739 = vmatprep.subr.bf16.mxu0 %v2946_v11  ;;  %v3511_v20 = vpack.c.bf16 %v3508_v34, %v876_v56  ;;  %v2952_v36 = vld [vmem:[%s3728_s3 + $0x158] sm:$0xff]  }
 0x120   : > { %2713 = vmatprep.subr.bf16.mxu1 %v2945_v37 }
 0x122   : > { %2682 = vmatmul.mubr.bf16.vlgmr.msra.gmra.mxu1 %v3474_v24  ;;  %2740 = vmatpush3.bf16.msra.mxu0 %v2946_v11  ;;  %v1325_v11 = vpack.c.bf16 %v3477_v27, %v3465_v7  ;;  %v2963_v7 = vld [vmem:[%s3728_s3 + $0x1b0] sm:$0xff]   ;;  %v1327_v27 = vpack.c.bf16 %v3423_v17, %v3508_v34  ;;  %v2988_v17 = vld [vmem:[%s3730_s5 + $0x18] sm:$0xff]  }
 0x123   : > { %2685 = vmatprep.mubr.bf16.mxu1 %v3488_v15  ;;  %2714 = vmatpush3.bf16.msra.mxu1 %v2945_v37  ;;  %v1326_v37 = vpack.c.bf16 %v876_v56, %v3470_v19  ;;  %v2964_v19 = vld [vmem:[%s3728_s3 + $0x1e8] sm:$0xff]  }
 0x124   : > { %2715 = vmatprep.subr.bf16.mxu1 %v2947_v39  ;;  %2741 = vmatprep.subr.bf16.mxu0 %v2948_v53 }
 0x125   : > { %2710 = vmatmul.mubr.msk.bf16.gmra.mxu0 %vm3238_vm5, %v2303_v29  ;;  %v2977_v29 = vld [vmem:[%s3728_s3 + $0x230] sm:$0xff]  }
 0x126   : > { %2742 = vmatpush3.bf16.msra.mxu0 %v2948_v53  ;;  %2753 = vmatprep.mubr.bf16.mxu0 %v1324_v63  ;;  %v2972_v53 = vld [vmem:[%s3728_s3 + $0x1c8] sm:$0xff]  }
 0x127   : > { %2716 = vmatpush3.bf16.msra.mxu1 %v2947_v39  ;;  %2743 = vmatprep.subr.bf16.mxu0 %v2950_v61  ;;  %v2968_v39 = vld [vmem:[%s3728_s3 + $0x1d8] sm:$0xff]  }
 0x128   : > { %2717 = vmatprep.subr.bf16.mxu1 %v2949_v25 }
 0x12a   : > { %2686 = vmatmul.mubr.bf16.gmra.mxu1 %v3511_v20  ;;  %2744 = vmatpush3.bf16.msra.mxu0 %v2950_v61  ;;  %v2991_v61 = vld [vmem:[%s3730_s5] sm:$0xff]  }
 0x12b   : > { %2718 = vmatpush3.bf16.msra.mxu1 %v2949_v25  ;;  %2729 = vmatprep.mubr.bf16.mxu1 %v1178_v42  ;;  %v3678_v25 = vpop.f32.mrf.mxu0 }
 0x12c   : > { %2719 = vmatprep.subr.bf16.mxu1 %v2951_v45  ;;  %2745 = vmatprep.subr.bf16.mxu0 %v2952_v36  ;;  %3746 = vst [vmem:[#allocation10_spill] sm:$0xff] %v3678_v25 }
 0x12e   : > { %2746 = vmatpush3.bf16.msra.mxu0 %v2952_v36 }
 0x12f   : > { %2720 = vmatpush3.bf16.msra.mxu1 %v2951_v45  ;;  %2747 = vmatprep.subr.bf16.mxu0 %v2954_v44 }
 0x130   : > { %2721 = vmatprep.subr.bf16.mxu1 %v2953_v51 }
 0x132   : > { %2748 = vmatpush3.bf16.msra.mxu0 %v2954_v44 }
 0x133   : > { %2722 = vmatpush3.bf16.msra.mxu1 %v2953_v51  ;;  %2749 = vmatprep.subr.bf16.mxu0 %v2956_v4 }
 0x134   : > { %2723 = vmatprep.subr.bf16.mxu1 %v2955_v28 }
 0x136   : > { %2750 = vmatpush3.bf16.msra.mxu0 %v2956_v4 }
 0x137   : > { %2724 = vmatpush3.bf16.msra.mxu1 %v2955_v28  ;;  %2751 = vmatprep.subr.bf16.mxu0 %v2958_v50 }
 0x138   : > { %2725 = vmatprep.subr.bf16.mxu1 %v2957_v55 }
 0x13a   : > { %2752 = vmatpush3.bf16.msra.mxu0 %v2958_v50 }
 0x13b   : > { %2726 = vmatpush3.bf16.msra.mxu1 %v2957_v55  ;;  %2785 = vmatprep.subr.bf16.mxu0 %v2960_v57 }
 0x13c   : > { %2727 = vmatprep.subr.bf16.mxu1 %v2959_v1 }
 0x13d   : > { %2754 = vmatmul.mubr.bf16.vlgmr.msra.gmra.mxu0 %v1325_v11 }
 0x13e   : > { %2757 = vmatprep.mubr.bf16.mxu0 %v1326_v37  ;;  %2786 = vmatpush3.bf16.msra.mxu0 %v2960_v57 }
 0x13f   : > { %2728 = vmatpush3.bf16.msra.mxu1 %v2959_v1  ;;  %2787 = vmatprep.subr.bf16.mxu0 %v2962_v12 }
 0x140   : > { %2761 = vmatprep.subr.bf16.mxu1 %v2961_v5 }
 0x142   : > { %2730 = vmatmul.mubr.bf16.vlgmr.msra.gmra.mxu1 %v1179_v3  ;;  %2788 = vmatpush3.bf16.msra.mxu0 %v2962_v12 }
 0x143   : > { %2733 = vmatprep.mubr.bf16.mxu1 %v1180_v31  ;;  %2762 = vmatpush3.bf16.msra.mxu1 %v2961_v5 }
 0x144   : > { %2763 = vmatprep.subr.bf16.mxu1 %v2963_v7  ;;  %2789 = vmatprep.subr.bf16.mxu0 %v2964_v19 }
 0x145   : > { %2758 = vmatmul.mubr.bf16.gmra.mxu0 %v1327_v27 }
 0x146   : > { %2790 = vmatpush3.bf16.msra.mxu0 %v2964_v19  ;;  %2801 = vmatprep.mubr.bf16.mxu0 %v3293_v33  ;;  %v2970_v33 = vld [vmem:[%s3728_s3 + $0x1d0] sm:$0xff]  }
 0x147   : > { %2764 = vmatpush3.bf16.msra.mxu1 %v2963_v7  ;;  %2791 = vmatprep.subr.bf16.mxu0 %v2966_v30 }
 0x148   : > { %2765 = vmatprep.subr.bf16.mxu1 %v2965_v2 }
 0x14a   : > { %2734 = vmatmul.mubr.bf16.gmra.mxu1 %v1181_v59  ;;  %2792 = vmatpush3.bf16.msra.mxu0 %v2966_v30 }
 0x14b   : > { %2766 = vmatpush3.bf16.msra.mxu1 %v2965_v2  ;;  %2777 = vmatprep.mubr.msk.bf16.mxu1 %vm3238_vm5, %v3254_v13  ;;  %v2971_v13 = vld [vmem:[%s3728_s3 + $0x190] sm:$0xff]  }
 0x14c   : > { %2767 = vmatprep.subr.bf16.mxu1 %v2967_v32  ;;  %2793 = vmatprep.subr.bf16.mxu0 %v2968_v39 }
 0x14e   : > { %2794 = vmatpush3.bf16.msra.mxu0 %v2968_v39 }
 0x14f   : > { %2768 = vmatpush3.bf16.msra.mxu1 %v2967_v32  ;;  %2795 = vmatprep.subr.bf16.mxu0 %v2970_v33 }
 0x150   : > { %2769 = vmatprep.subr.bf16.mxu1 %v2969_v49 }
 0x152   : > { %2796 = vmatpush3.bf16.msra.mxu0 %v2970_v33 }
 0x153   : > { %2770 = vmatpush3.bf16.msra.mxu1 %v2969_v49  ;;  %2797 = vmatprep.subr.bf16.mxu0 %v2972_v53 }
 0x154   : > { %2771 = vmatprep.subr.bf16.mxu1 %v2971_v13 }
 0x156   : > { %2798 = vmatpush3.bf16.msra.mxu0 %v2972_v53 }
 0x157   : > { %2772 = vmatpush3.bf16.msra.mxu1 %v2971_v13  ;;  %2799 = vmatprep.subr.bf16.mxu0 %v2974_v14 }
 0x158   : > { %2773 = vmatprep.subr.bf16.mxu1 %v2973_v6 }
 0x15a   : > { %2800 = vmatpush3.bf16.msra.mxu0 %v2974_v14 }
 0x15b   : > { %2774 = vmatpush3.bf16.msra.mxu1 %v2973_v6 }
 0x15c   : > { %2775 = vmatprep.subr.bf16.mxu1 %v2975_v16 }
 0x15d   : > { %2802 = vmatmul.mubr.bf16.vlgmr.msra.gmra.mxu0 %v3351_v8  ;;  %v2978_v8 = vld [vmem:[%s3728_s3 + $0x228] sm:$0xff]  }
 0x15e   : > { %2805 = vmatprep.mubr.bf16.mxu0 %v3411_v60  ;;  %v2985_v60 = vld [vmem:[%s3730_s5 + $0x30] sm:$0xff]  }
 0x15f   : > { %2776 = vmatpush3.bf16.msra.mxu1 %v2975_v16 }
 0x160   : > { %2809 = vmatprep.subr.bf16.mxu1 %v2976_v22 }
 0x162   : > { %2778 = vmatmul.mubr.msk.bf16.vlgmr.msra.gmra.mxu1 %vm3238_vm5, %v3317_v47  ;;  %v2394_v47 = vpack.c.bf16 %v3003_v54, %v3387_v41  ;;  %v2982_v54 = vld [vmem:[%s3728_s3 + $0x208] sm:$0xff]   ;;  %v2984_v41 = vld [vmem:[%s3730_s5 + $0x38] sm:$0xff]  }
 0x163   : > { %2781 = vmatprep.mubr.msk.bf16.mxu1 %vm3238_vm5, %v3377_v26  ;;  %2810 = vmatpush3.bf16.msra.mxu1 %v2976_v22  ;;  %v2983_v26 = vld [vmem:[%s3728_s3 + $0x200] sm:$0xff]  }
 0x164   : > { %2811 = vmatprep.subr.bf16.mxu1 %v2977_v29  ;;  %2833 = vmatprep.subr.bf16.mxu0 %v2984_v41 }
 0x165   : > { %2806 = vmatmul.mubr.bf16.gmra.mxu0 %v1605_v58 }
 0x166   : > { %2834 = vmatpush3.bf16.msra.mxu0 %v2984_v41 }
 0x167   : > { %2812 = vmatpush3.bf16.msra.mxu1 %v2977_v29  ;;  %2835 = vmatprep.subr.bf16.mxu0 %v2985_v60 }
 0x168   : > { %2813 = vmatprep.subr.bf16.mxu1 %v2978_v8 }
 0x16a   : > { %2782 = vmatmul.mubr.msk.bf16.gmra.mxu1 %vm2393_vm7, %v2394_v47  ;;  %2836 = vmatpush3.bf16.msra.mxu0 %v2985_v60 }
 0x16b   : > { %2814 = vmatpush3.bf16.msra.mxu1 %v2978_v8  ;;  %2825 = vmatprep.mubr.bf16.mxu1 %v3474_v24  ;;  %v2990_v24 = vld [vmem:[%s3730_s5 + $0x8] sm:$0xff]  }
 0x16c   : > { %2815 = vmatprep.subr.bf16.mxu1 %v2979_v9  ;;  %2837 = vmatprep.subr.bf16.mxu0 %v2986_v18 }
 0x16e   : > { %2838 = vmatpush3.bf16.msra.mxu0 %v2986_v18 }
 0x16f   : > { %2816 = vmatpush3.bf16.msra.mxu1 %v2979_v9  ;;  %2839 = vmatprep.subr.bf16.mxu0 %v2987_v43 }
 0x170   : > { %2817 = vmatprep.subr.bf16.mxu1 %v2980_v62 }
 0x172   : > { %2840 = vmatpush3.bf16.msra.mxu0 %v2987_v43 }
 0x173   : > { %2818 = vmatpush3.bf16.msra.mxu1 %v2980_v62  ;;  %2841 = vmatprep.subr.bf16.mxu0 %v2988_v17 }
 0x174   : > { %2819 = vmatprep.subr.bf16.mxu1 %v2981_v48 }
 0x176   : > { %2842 = vmatpush3.bf16.msra.mxu0 %v2988_v17 }
 0x177   : > { %2820 = vmatpush3.bf16.msra.mxu1 %v2981_v48 }
 0x178   : > { %2821 = vmatprep.subr.bf16.mxu1 %v2982_v54 }
 0x17b   : > { %2822 = vmatpush3.bf16.msra.mxu1 %v2982_v54 }
 0x17c   : > { %2823 = vmatprep.subr.bf16.mxu1 %v2983_v26 }
 0x17f   : > { %2824 = vmatpush3.bf16.msra.mxu1 %v2983_v26 }
 0x180   : > { %2857 = vmatprep.subr.bf16.mxu1 %v2984_v41 }
 0x182   : > { %2826 = vmatmul.mubr.bf16.vlgmr.msra.gmra.mxu1 %v3488_v15 }
 0x183   : > { %2829 = vmatprep.mubr.bf16.mxu1 %v3511_v20  ;;  %2865 = vmatpush3.bf16.msra.mxu1 %v2984_v41 }
 0x184   : > { %2858 = vmatprep.subr.bf16.mxu1 %v2985_v60 }
 0x187   : > { %2866 = vmatpush3.bf16.msra.mxu1 %v2985_v60 }
 0x188   : > { %2859 = vmatprep.subr.bf16.mxu1 %v2986_v18 }
 0x18a   : > { %2830 = vmatmul.mubr.bf16.gmra.mxu1 %v1744_v21  ;;  %v2989_v21 = vld [vmem:[%s3730_s5 + $0x10] sm:$0xff]  }
 0x18b   : > { %2867 = vmatpush3.bf16.msra.mxu1 %v2986_v18  ;;  %2843 = vmatprep.subr.bf16.mxu0 %v2989_v21 }
 0x18c   : > { %2860 = vmatprep.subr.bf16.mxu1 %v2987_v43  ;;  %2844 = vmatpush3.bf16.msra.mxu0 %v2989_v21 }
 0x18d   : > { %2845 = vmatprep.subr.bf16.mxu0 %v2990_v24 }
 0x18f   : > { %2868 = vmatpush3.bf16.msra.mxu1 %v2987_v43 }
 0x190   : > { %2861 = vmatprep.subr.bf16.mxu1 %v2988_v17  ;;  %2846 = vmatpush3.bf16.msra.mxu0 %v2990_v24 }
 0x191   : > { %2847 = vmatprep.subr.bf16.mxu0 %v2991_v61 }
 0x193   : > { %2869 = vmatpush3.bf16.msra.mxu1 %v2988_v17 }
 0x194   : > { %2862 = vmatprep.subr.bf16.mxu1 %v2989_v21  ;;  %2848 = vmatpush3.bf16.msra.mxu0 %v2991_v61 }
 0x197   : > { %2870 = vmatpush3.bf16.msra.mxu1 %v2989_v21 }
 0x198   : > { %2863 = vmatprep.subr.bf16.mxu1 %v2990_v24 }
 0x19b   : > { %2871 = vmatpush3.bf16.msra.mxu1 %v2990_v24 }
 0x19c   : > { %2864 = vmatprep.subr.bf16.mxu1 %v2991_v61 }
 0x19f   : > { %2872 = vmatpush3.bf16.msra.mxu1 %v2991_v61 }
 0x1bd   : > { %v2659_v34 = vpop.f32.mrf.mxu0 }
 0x1bf   : > { %v825_v45 = vpop.f32.mrf.mxu0 }
 0x1c1   : > { %v3670_v58 = vpop.f32.mrf.mxu1  ;;  %v2660_v42 = vpop.f32.mrf.mxu0 }
 0x1c2   : > { %v834_v24 = vadd.f32 %v2659_v34, %v3670_v58 }
 0x1c3   : > { %v712_v15 = vpop.f32.mrf.mxu1  ;;  %v828_v51 = vpop.f32.mrf.mxu0 }
 0x1c4   : > { %v826_v21 = vadd.f32 %v825_v45, %v712_v15 }
 0x1c5   : > { %v2636_v63 = vpop.f32.mrf.mxu1 }
 0x1c6   : > { %v837_v35 = vadd.f32 %v2660_v42, %v2636_v63 }
 0x1c7   : > { %v715_v56 = vpop.f32.mrf.mxu1 }
 0x1c8   : > { %v829_v52 = vadd.f32 %v828_v51, %v715_v56 }
 0x1cd   : > { %v2663_v28 = vpop.f32.mrf.mxu0 }
 0x1cf   : > { %v841_v55 = vpop.f32.mrf.mxu0 }
 0x1d1   : > { %v3680_v20 = vpop.f32.mrf.mxu1  ;;  %v2664_v1 = vpop.f32.mrf.mxu0 }
 0x1d2   : > { %3747 = vst [vmem:[#allocation11_spill] sm:$0xff] %v3680_v20 }
 0x1d3   : > { %v728_v36 = vpop.f32.mrf.mxu1  ;;  %v844_v12 = vpop.f32.mrf.mxu0 }
 0x1d5   : > { %v3682_v44 = vpop.f32.mrf.mxu1 }
 0x1d6   : > { %3748 = vst [vmem:[#allocation12_spill] sm:$0xff] %v3682_v44 }
 0x1d7   : > { %v3684_v4 = vpop.f32.mrf.mxu1 }
 0x1d8   : > { %3749 = vst [vmem:[#allocation13_spill] sm:$0xff] %v3684_v4 }
 0x1dd   : > { %v2707_v5 = vpop.f32.mrf.mxu0  ;;  %v3754_v58 = vld [vmem:[#allocation12_spill] sm:$0xff] }
 0x1de   : > { %v853_v42 = vadd.f32 %v2664_v1, %v3754_v58 }
 0x1df   : > { %v1133_v7 = vpop.f32.mrf.mxu0 }
 0x1e1   : > { %v2708_v31 = vpop.f32.mrf.mxu0 }
 0x1e2   : > { %v2683_v50 = vpop.f32.mrf.mxu1 }
 0x1e3   : > { %v1136_v30 = vpop.f32.mrf.mxu0  ;;  %v1024_v23 = vadd.f32 %v2683_v50, %v834_v24 }
 0x1e4   : > { %v991_v57 = vpop.f32.mrf.mxu1 }
 0x1e5   : > { %v2711_v59 = vpop.f32.mrf.mxu0  ;;  %v1022_v25 = vadd.f32 %v991_v57, %v826_v21  ;;  %v3755_v21 = vld [vmem:[#allocation13_spill] sm:$0xff] }
 0x1e6   : > { %v2684_v11 = vpop.f32.mrf.mxu1  ;;  %v845_v56 = vadd.f32 %v844_v12, %v3755_v21 }
 0x1e7   : > { %v1149_v39 = vpop.f32.mrf.mxu0  ;;  %v1025_v10 = vadd.f32 %v2684_v11, %v837_v35  ;;  %v1164_v40 = vadd.f32 %v1133_v7, %v1022_v25 }
 0x1e8   : > { %v994_v37 = vpop.f32.mrf.mxu1 }
 0x1e9   : > { %v2712_v49 = vpop.f32.mrf.mxu0  ;;  %v1023_v0 = vadd.f32 %v994_v37, %v829_v52  ;;  %v1167_v20 = vadd.f32 %v2708_v31, %v1025_v10 }
 0x1ea   : > { %v2687_v3 = vpop.f32.mrf.mxu1 }
 0x1eb   : > { %v1152_v13 = vpop.f32.mrf.mxu0  ;;  %v1165_v50 = vadd.f32 %v1136_v30, %v1023_v0 }
 0x1ec   : > { %v1007_v19 = vpop.f32.mrf.mxu1 }
 0x1ee   : > { %v2688_v27 = vpop.f32.mrf.mxu1 }
 0x1ef   : > { %v1029_v52 = vadd.f32 %v2688_v27, %v853_v42 }
 0x1f0   : > { %v1010_v2 = vpop.f32.mrf.mxu1 }
 0x1f1   : > { %v1027_v11 = vadd.f32 %v1010_v2, %v845_v56 }
 0x1f3   : > { %v1169_v12 = vadd.f32 %v1152_v13, %v1027_v11  ;;  %v2444_v13 = vld [vmem:[%s3729_s4] ss:$0 sm:$0xff] }
 0x1fd   : > { %v2755_v6 = vpop.f32.mrf.mxu0 }
 0x1ff   : > { %v1427_v22 = vpop.f32.mrf.mxu0 }
 0x201   : > { %v2756_v8 = vpop.f32.mrf.mxu0 }
 0x202   : > { %v2731_v32 = vpop.f32.mrf.mxu1 }
 0x203   : > { %v1430_v9 = vpop.f32.mrf.mxu0 }
 0x204   : > { %v1281_v33 = vpop.f32.mrf.mxu1 }
 0x205   : > { %v3686_v48 = vpop.f32.mrf.mxu0  ;;  %v1312_v44 = vadd.f32 %v1281_v33, %v1164_v40 }
 0x206   : > { %v2732_v53 = vpop.f32.mrf.mxu1  ;;  %3750 = vst [vmem:[#allocation14_spill] sm:$0xff] %v3686_v48  ;;  %v1166_v48 = vadd.f32 %v2707_v5, %v1024_v23 }
 0x207   : > { %v1443_v26 = vpop.f32.mrf.mxu0  ;;  %v1315_v57 = vadd.f32 %v2732_v53, %v1167_v20  ;;  %v1458_v23 = vadd.f32 %v1427_v22, %v1312_v44 }
 0x208   : > { %v1284_v14 = vpop.f32.mrf.mxu1  ;;  %v1314_v45 = vadd.f32 %v2731_v32, %v1166_v48 }
 0x209   : > { %v3688_v60 = vpop.f32.mrf.mxu0  ;;  %v1313_v25 = vadd.f32 %v1284_v14, %v1165_v50 }
 0x20a   : > { %v2735_v16 = vpop.f32.mrf.mxu1  ;;  %3751 = vst [vmem:[#allocation15_spill] sm:$0xff] %v3688_v60  ;;  %v842_v60 = vadd.f32 %v841_v55, %v728_v36  ;;  %v1460_v36 = vadd.f32 %v2755_v6, %v1314_v45 }
 0x20b   : > { %v3690_v43 = vpop.f32.mrf.mxu0  ;;  %v1459_v0 = vadd.f32 %v1430_v9, %v1313_v25 }
 0x20c   : > { %v1297_v29 = vpop.f32.mrf.mxu1  ;;  %3752 = vst [vmem:[#allocation16_spill] sm:$0xff] %v3690_v43  ;;  %v3753_v43 = vld [vmem:[#allocation11_spill] sm:$0xff]  ;;  %v1026_v63 = vadd.f32 %v1007_v19, %v842_v60  ;;  %v1171_v19 = vadd.f32 %v2712_v49, %v1029_v52 }
 0x20d   : > { %v850_v15 = vadd.f32 %v2663_v28, %v3753_v43  ;;  %v1461_v28 = vadd.f32 %v2756_v8, %v1315_v57  ;;  %v3756_v22 = vld [vmem:[#allocation14_spill] sm:$0xff] }
 0x20e   : > { %v2736_v47 = vpop.f32.mrf.mxu1  ;;  %v1168_v10 = vadd.f32 %v1149_v39, %v1026_v63 }
 0x20f   : > { %v1028_v35 = vadd.f32 %v2687_v3, %v850_v15  ;;  %v1319_v27 = vadd.f32 %v2736_v47, %v1171_v19 }
 0x210   : > { %v1300_v62 = vpop.f32.mrf.mxu1  ;;  %v1316_v1 = vadd.f32 %v1297_v29, %v1168_v10 }
 0x211   : > { %v1170_v37 = vadd.f32 %v2711_v59, %v1028_v35  ;;  %v1317_v2 = vadd.f32 %v1300_v62, %v1169_v12  ;;  %v3757_v9 = vld [vmem:[#allocation15_spill] sm:$0xff]  ;;  %v3759_v12 = vld [vmem:[#allocation2_spill] sm:$0xff] }
 0x212   : > { %v1462_v39 = vadd.f32 %v1443_v26, %v1316_v1 }
 0x213   : > { %v1318_v31 = vadd.f32 %v2735_v16, %v1170_v37  ;;  %v1465_v16 = vadd.f32 %v3757_v9, %v1319_v27 }
 0x215   : > { %v1464_v8 = vadd.f32 %v3756_v22, %v1318_v31 }
 0x21d   : > { %v2803_v61 = vpop.f32.mrf.mxu0 }
 0x21f   : > { %v1705_v46 = vpop.f32.mrf.mxu0 }
 0x221   : > { %v2804_v34 = vpop.f32.mrf.mxu0 }
 0x222   : > { %v2779_v54 = vpop.f32.mrf.mxu1 }
 0x223   : > { %v1708_v40 = vpop.f32.mrf.mxu0  ;;  %v1599_v5 = vadd.f32 %v2779_v54, %v1460_v36  ;;  %v3758_v54 = vld [vmem:[#allocation16_spill] sm:$0xff] }
 0x224   : > { %v1566_v41 = vpop.f32.mrf.mxu1 }
 0x225   : > { %v1597_v55 = vadd.f32 %v1566_v41, %v1458_v23  ;;  %v2807_v3 = vpop.f32.mrf.mxu0  ;;  %v1738_v33 = vadd.f32 %v2803_v61, %v1599_v5  ;;  %v1463_v41 = vadd.f32 %v3758_v54, %v1317_v2 }
 0x226   : > { %v2780_v18 = vpop.f32.mrf.mxu1 }
 0x227   : > { %v1600_v20 = vadd.f32 %v2780_v18, %v1461_v28  ;;  %v1736_v44 = vadd.f32 %v1705_v46, %v1597_v55  ;;  %v1721_v59 = vpop.f32.mrf.mxu0 }
 0x228   : > { %v1569_v17 = vpop.f32.mrf.mxu1 }
 0x229   : > { %v1598_v32 = vadd.f32 %v1569_v17, %v1459_v0  ;;  %v1739_v6 = vadd.f32 %v2804_v34, %v1600_v20  ;;  %v2808_v24 = vpop.f32.mrf.mxu0 }
 0x22a   : > { %v2783_v38 = vpop.f32.mrf.mxu1 }
 0x22b   : > { %v1737_v46 = vadd.f32 %v1708_v40, %v1598_v32  ;;  %v1603_v62 = vadd.f32 %v2783_v38, %v1464_v8  ;;  %v1724_v56 = vpop.f32.mrf.mxu0  ;;  %v2992_v32 = vld [vmem:[%s3727_s2] sm:$0x3] }
 0x22c   : > { %v1582_v4 = vpop.f32.mrf.mxu1  ;;  %v3762_v8 = vld [vmem:[#allocation6_spill] sm:$0xff] }
 0x22d   : > { %v1601_v48 = vadd.f32 %v1582_v4, %v1462_v39  ;;  %v1742_v42 = vadd.f32 %v2807_v3, %v1603_v62  ;;  %v312_v3 = vsub.s32 1, %v3759_v12 }
 0x22e   : > { %v2784_v51 = vpop.f32.mrf.mxu1 }
 0x22f   : > { %v1604_v60 = vadd.f32 %v2784_v51, %v1465_v16  ;;  %v1740_v34 = vadd.f32 %v1721_v59, %v1601_v48  ;;  %v3761_v59 = vld [vmem:[#allocation3_spill] sm:$0xff]  ;;  %v3763_v16 = vld [vmem:[#allocation4_spill] sm:$0xff] }
 0x230   : > { %v1585_v7 = vpop.f32.mrf.mxu1 }
 0x231   : > { %v1602_v4 = vadd.f32 %v1585_v7, %v1463_v41  ;;  %v1743_v38 = vadd.f32 %v2808_v24, %v1604_v60 }
 0x233   : > { %v1741_v23 = vadd.f32 %v1724_v56, %v1602_v4 }
 0x242   : > { %v2827_v30 = vpop.f32.mrf.mxu1 }
 0x243   : > { %v1877_v29 = vadd.f32 %v2827_v30, %v1738_v33  ;;  %v2445_v30 = vld [vmem:[%s3731_s6] ss:$0 sm:$0xff] }
 0x244   : > { %v1844_v53 = vpop.f32.mrf.mxu1 }
 0x245   : > { %v1875_v14 = vadd.f32 %v1844_v53, %v1736_v44  ;;  %v1892_v61 = vadd.f32 %v2444_v13, %v1877_v29  ;;  %v313_v44 = vrot.slane %v2992_v32, %v312_v3  ;;  %v3760_v53 = vld [vmem:[#allocation5_spill] sm:$0xff] }
 0x246   : > { %v2828_v49 = vpop.f32.mrf.mxu1 }
 0x247   : > { %v1878_v47 = vadd.f32 %v2828_v49, %v1739_v6  ;;  %v1890_v18 = vadd.f32 %v2444_v13, %v1875_v14  ;;  %v1900_v35 = vmax.f32 %v1892_v61, 0.0  ;;  %v467_v39 = vadd.f32 %v3760_v53, %v313_v44 }
 0x248   : > { %v1847_v26 = vpop.f32.mrf.mxu1  ;;  %v457_v22 = vadd.f32 %v3761_v59, %v313_v44  ;;  %v471_v29 = vadd.f32 %v3762_v8, %v313_v44 }
 0x249   : > { %v1893_v43 = vadd.f32 %v2444_v13, %v1878_v47  ;;  %v1876_v17 = vadd.f32 %v1847_v26, %v1737_v46  ;;  %v1898_v57 = vmax.f32 %v1890_v18, 0.0 }
 0x24a   : > { %v2831_v15 = vpop.f32.mrf.mxu1 }
 0x24b   : > { %v1891_v45 = vadd.f32 %v2444_v13, %v1876_v17  ;;  %v1901_v58 = vmax.f32 %v1893_v43, 0.0  ;;  %v1881_v52 = vadd.f32 %v2831_v15, %v1742_v42  ;;  %v3764_v43 = vld [vmem:[#allocation9_spill] sm:$0xff] }
 0x24c   : > { %v1860_v63 = vpop.f32.mrf.mxu1  ;;  %v487_v17 = vadd.f32 %v3764_v43, %v313_v44 }
 0x24d   : > { %v1899_v50 = vmax.f32 %v1891_v45, 0.0  ;;  %v1879_v21 = vadd.f32 %v1860_v63, %v1740_v34  ;;  %v1907_v36 = vpack.c.bf16 %v1901_v58, %v1900_v35  ;;  %v1896_v37 = vadd.f32 %v2444_v13, %v1881_v52  ;;  %v3765_v34 = vld [vmem:[#allocation7_spill] sm:$0xff]  ;;  %v3766_v63 = vld [vmem:[#allocation10_spill] sm:$0xff]  ;;  %v3767_v35 = vld [vmem:[#allocation8_spill] sm:$0xff] }
 0x24e   : > { %v2832_v51 = vpop.f32.mrf.mxu1  ;;  %v477_v58 = vadd.f32 %v3765_v34, %v313_v44  ;;  %v481_v52 = vadd.f32 %v3767_v35, %v313_v44 }
 0x24f   : > { %v1882_v25 = vadd.f32 %v2832_v51, %v1743_v38  ;;  %v1906_v11 = vpack.c.bf16 %v1899_v50, %v1898_v57  ;;  %v1894_v10 = vadd.f32 %v2444_v13, %v1879_v21  ;;  %v1904_v20 = vmax.f32 %v1896_v37, 0.0 }
 0x250   : > { %v1863_v40 = vpop.f32.mrf.mxu1  ;;  %v491_v57 = vadd.f32 %v3766_v63, %v313_v44 }
 0x251   : > { %v1897_v55 = vadd.f32 %v2444_v13, %v1882_v25  ;;  %v1880_v28 = vadd.f32 %v1863_v40, %v1741_v23  ;;  %2849 = vmatprep.mubr.bf16.mxu0 %v1906_v11  ;;  %v1902_v1 = vmax.f32 %v1894_v10, 0.0 }
 0x252   : > { %2850 = vmatmul.mubr.bf16.vlgmr.msra.gmra.mxu0 %v1907_v36 }
 0x253   : > { %v1895_v5 = vadd.f32 %v2444_v13, %v1880_v28  ;;  %v1905_v7 = vmax.f32 %v1897_v55, 0.0  ;;  %v461_v13 = vadd.f32 %v3763_v16, %v313_v44 }
 0x255   : > { %v1903_v19 = vmax.f32 %v1895_v5, 0.0  ;;  %v1909_v31 = vpack.c.bf16 %v1905_v7, %v1904_v20 }
 0x257   : > { %v1908_v0 = vpack.c.bf16 %v1903_v19, %v1902_v1 }
 0x259   : > { %2853 = vmatprep.mubr.bf16.mxu1 %v1908_v0 }
 0x25a   : > { %2854 = vmatmul.mubr.bf16.vlgmr.msra.gmra.mxu1 %v1909_v31 }
 0x312   : > { %v2851_v27 = vpop.f32.mrf.mxu0 }
 0x313   : > { %v2024_v2 = vadd.f32 %v2851_v27, %v2445_v30 }
 0x314   : > { %v2015_v33 = vpop.f32.mrf.mxu0 }
 0x315   : > { %v2016_v14 = vadd.f32 %v2445_v30, %v2015_v33  ;;  %v2048_v49 = vadd.f32 %v2024_v2, %v467_v39 }
 0x316   : > { %v2852_v6 = vpop.f32.mrf.mxu0 }
 0x317   : > { %v2027_v48 = vadd.f32 %v2852_v6, %v2445_v30  ;;  %v2046_v47 = vadd.f32 %v2016_v14, %v457_v22  ;;  %v2056_v41 = vmax.f32 %v2048_v49, 0.0 }
 0x318   : > { %v2018_v9 = vpop.f32.mrf.mxu0 }
 0x319   : > { %v2049_v46 = vadd.f32 %v2027_v48, %v471_v29  ;;  %v2019_v62 = vadd.f32 %v2445_v30, %v2018_v9  ;;  %v2054_v61 = vmax.f32 %v2046_v47, 0.0 }
 0x31a   : > { %v2855_v54 = vpop.f32.mrf.mxu1 }
 0x31b   : > { %v2057_v26 = vmax.f32 %v2049_v46, 0.0  ;;  %v2047_v60 = vadd.f32 %v2019_v62, %v461_v13  ;;  %v2040_v18 = vadd.f32 %v2855_v54, %v2445_v30 }
 0x31c   : > { %v2031_v24 = vpop.f32.mrf.mxu1 }
 0x31d   : > { %v2482_v15 = vpack.c.bf16 %v2057_v26, %v2056_v41  ;;  %v2055_v4 = vmax.f32 %v2047_v60, 0.0  ;;  %v2032_v45 = vadd.f32 %v2445_v30, %v2031_v24  ;;  %v2052_v21 = vadd.f32 %v2040_v18, %v487_v17 }
 0x31e   : > { %v2856_v42 = vpop.f32.mrf.mxu1 }
 0x31f   : > { %2494 = vst [vmem:[%s278_s9 + $0x8] sm:$0xff] %v2482_v15   ;;  %v2477_v50 = vpack.c.bf16 %v2055_v4, %v2054_v61  ;;  %v2043_v38 = vadd.f32 %v2856_v42, %v2445_v30  ;;  %v2050_v51 = vadd.f32 %v2032_v45, %v477_v58  ;;  %v2060_v11 = vmax.f32 %v2052_v21, 0.0 }
 0x320   : > { %v2034_v56 = vpop.f32.mrf.mxu1 }
 0x321   : > { %2478 = vst [vmem:[%s278_s9] sm:$0xff] %v2477_v50   ;;  %v2053_v25 = vadd.f32 %v2043_v38, %v491_v57  ;;  %v2035_v23 = vadd.f32 %v2445_v30, %v2034_v56  ;;  %v2058_v10 = vmax.f32 %v2050_v51, 0.0 }
 0x323   : > { %v2061_v36 = vmax.f32 %v2053_v25, 0.0  ;;  %v2051_v40 = vadd.f32 %v2035_v23, %v481_v52 }
 0x325   : > { %v2492_v55 = vpack.c.bf16 %v2061_v36, %v2060_v11  ;;  %v2059_v28 = vmax.f32 %v2051_v40, 0.0 }
 0x327   : > { %2496 = vst [vmem:[%s278_s9 + $0x18] sm:$0xff] %v2492_v55   ;;  %v2487_v37 = vpack.c.bf16 %v2059_v28, %v2058_v10 }
 0x329   : > { %2495 = vst [vmem:[%s278_s9 + $0x10] sm:$0xff] %v2487_v37  }
 0x32a PF: > { %s17_s24 = sadd.s32 1, %s2999_s24  }
 0x32b   : > { %p14_p4 = scmp.ge.s32.totalorder %s17_s24, 4  }
 0x32d   :  { %16 = sbr.rel (!%p14_p4) target bundleno = 1 (0x1), region = 86 }

// kernel: _lambda_.3
= control target key start
LH: loop header
LB: loop body
LE: loop exit
PB: predicated region body
PF: predicated region fallthrough
CT: control target
= control target key end

     0   :  { %s3025_s24 = smov 0   ;;  %s3643_s0 = inlined_call_operand.vmem [shape: bf16[2,64,128], index: 0, kind: input, shape index: {}]   ;;  %s3644_s1 = inlined_call_operand.vmem [shape: bf16[128,128], index: 1, kind: input, shape index: {}]   ;;  %s3645_s2 = inlined_call_operand.vmem [shape: f32[1,128], index: 2, kind: input, shape index: {}, may-alias: {2,4,6}]   ;;  %s3646_s3 = inlined_call_operand.vmem [shape: bf16[9,128,128], index: 3, kind: input, shape index: {}]   ;;  %s3647_s4 = inlined_call_operand.vmem [shape: f32[1,128], index: 4, kind: input, shape index: {}, may-alias: {2,4,6}]   ;;  %s3648_s5 = inlined_call_operand.vmem [shape: bf16[128,128], index: 5, kind: input, shape index: {}]   ;;  %s3649_s6 = inlined_call_operand.vmem [shape: f32[1,128], index: 6, kind: input, shape index: {}, may-alias: {2,4,6}]   ;;  %s3650_s7 = inlined_call_operand.vmem [shape: bf16[2,64,128], index: 7, kind: output, shape index: {}]  }
   0x1 LB: > { %s2120_s25 = sadd.s32 4294967295, %s2981_s24   ;;  %p2124_p0 = scmp.ge.s32.totalorder %s2981_s24, 1  ;;  %s2981_s24 = sphi %s3025_s24, %s17_s24  }
   0x2   : > { %p237_p1 = scmp.lt.s32.totalorder %s2981_s24, 3 }
   0x4   : > { %p238_p2 = pnand %p2124_p0, %p237_p1 }
   0x6   : > { %241 = sbr.rel (%p238_p2) target bundleno = 809 (0x329), region = 48 }
   0xb   : > { %v2875_v0 = vld [vmem:[%s3644_s1 + $0x38] sm:$0xff]   ;;  %p269_p3 = scmp.lt.s32.totalorder %s2120_s25, 1  ;;  %v2876_v1 = vld [vmem:[%s3644_s1 + $0x30] sm:$0xff]   ;;  %v2877_v2 = vld [vmem:[%s3644_s1 + $0x28] sm:$0xff]   ;;  %vm488_vm0 = vcmask 1040384   ;;  %vm2983_vm2 = vmmov 1  }
   0xc   : > { %2585 = vmatprep.subr.bf16.mxu0 %v2875_v0  ;;  %v2878_v3 = vld [vmem:[%s3644_s1 + $0x20] sm:$0xff]   ;;  %v2888_v5 = vld [vmem:[%s3646_s3 + $0x78] sm:$0xff]   ;;  %v2890_v7 = vld [vmem:[%s3646_s3 + $0x70] sm:$0xff]   ;;  %v2984_v47 = vmov 0.0   ;;  %vm540_vm5 = vcmask 1046528   ;;  %vm819_vm6 = vcmask 1045504  }
   0xd   : > { %s3666_s25 = smov (!%p269_p3, %s2120_s25), 1  ;;  %2586 = vmatpush3.bf16.msra.mxu0 %v2875_v0  ;;  %v2879_v6 = vld [vmem:[%s3644_s1 + $0x18] sm:$0xff]   ;;  %2609 = vmatprep.subr.bf16.mxu1 %v2888_v5  ;;  %v2892_v8 = vld [vmem:[%s3646_s3 + $0x68] sm:$0xff]   ;;  %v2880_v9 = vld [vmem:[%s3644_s1 + $0x10] sm:$0xff]   ;;  %v3178_v0 = vrot.slane %v2984_v47, 1 }
   0xe   : > { %2587 = vmatprep.subr.bf16.mxu0 %v2876_v1  ;;  %s2420_s9 = sshll.u32 %s3666_s25, 5  ;;  %2610 = vmatpush3.bf16.msra.mxu1 %v2888_v5  ;;  %v2881_v10 = vld [vmem:[%s3644_s1 + $0x8] sm:$0xff]   ;;  %v2894_v11 = vld [vmem:[%s3646_s3 + $0x60] sm:$0xff]   ;;  %v2887_v15 = vld [vmem:[%s3646_s3 + $0x38] sm:$0xff]  }
   0xf   : > { %s3050_s12 = scalar_lea.vmem %s3643_s0, %s2420_s9  ;;  %2611 = vmatprep.subr.bf16.mxu1 %v2890_v7  ;;  %v2882_v12 = vld [vmem:[%s3644_s1] sm:$0xff]   ;;  %v2889_v16 = vld [vmem:[%s3646_s3 + $0x30] sm:$0xff]   ;;  %v2891_v18 = vld [vmem:[%s3646_s3 + $0x28] sm:$0xff]   ;;  %s278_s20 = scalar_lea.vmem %s3650_s7, %s2420_s9 }
  0x10   : > { %v280_v4 = vld [vmem:[%s3050_s12] sm:$0xff]   ;;  %v282_v13 = vld [vmem:[%s3050_s12 + $0x8] sm:$0xff]   ;;  %v284_v14 = vld [vmem:[%s3050_s12 + $0x10] sm:$0xff]  }
  0x11   : > { %2588 = vmatpush3.bf16.msra.mxu0 %v2876_v1  ;;  %2601 = vmatprep.mubr.bf16.mxu0 %v280_v4  ;;  %v286_v17 = vld [vmem:[%s3050_s12 + $0x18] sm:$0xff]   ;;  %v2893_v19 = vld [vmem:[%s3646_s3 + $0x20] sm:$0xff]   ;;  %v2897_v22 = vld [vmem:[%s3646_s3 + $0x10] sm:$0xff]  }
  0x12   : > { %2589 = vmatprep.subr.bf16.mxu0 %v2877_v2  ;;  %2612 = vmatpush3.bf16.msra.mxu1 %v2890_v7  ;;  %v2895_v20 = vld [vmem:[%s3646_s3 + $0x18] sm:$0xff]   ;;  %v2898_v23 = vld [vmem:[%s3646_s3 + $0x50] sm:$0xff]   ;;  %v2899_v24 = vld [vmem:[%s3646_s3 + $0x8] sm:$0xff]  }
  0x13   : > { %2613 = vmatprep.subr.bf16.mxu1 %v2892_v8  ;;  %v2896_v21 = vld [vmem:[%s3646_s3 + $0x58] sm:$0xff]   ;;  %v2900_v25 = vld [vmem:[%s3646_s3 + $0x48] sm:$0xff]   ;;  %v2901_v26 = vld [vmem:[%s3646_s3] sm:$0xff]  }
  0x14   : > { %v2902_v27 = vld [vmem:[%s3646_s3 + $0x40] sm:$0xff]   ;;  %v3122_v28 = vld [vmem:[%s3646_s3 + $0xf8] sm:$0xff]   ;;  %vm3135_vm1 = vmneg %vm488_vm0 }
  0x15   : > { %2590 = vmatpush3.bf16.msra.mxu0 %v2877_v2  ;;  %v3128_v29 = vld [vmem:[%s3646_s3 + $0xb8] sm:$0xff]   ;;  %v2129_v30 = vld [vmem:[%s3645_s2] ss:$0 sm:$0xff]  ;;  %vm2175_vm3 = vmpackc.low %vm3135_vm1, %vm2983_vm2 }
  0x16   : > { %2591 = vmatprep.subr.bf16.mxu0 %v2878_v3  ;;  %2614 = vmatpush3.bf16.msra.mxu1 %v2892_v8  ;;  %vm3173_vm4 = vmpackc.low %vm3135_vm1, %vm3135_vm1  ;;  %v2905_v7 = vld [vmem:[%s3646_s3 + $0xf0] sm:$0xff]   ;;  %v2954_v62 = vld [vmem:[%s3646_s3 + $0x220] sm:$0xff]  }
  0x17   : > { %2615 = vmatprep.subr.bf16.mxu1 %v2894_v11  ;;  %vm2349_vm7 = vmpackc.low %vm2983_vm2, %vm3135_vm1  ;;  %v2956_v39 = vld [vmem:[%s3646_s3 + $0x210] sm:$0xff]  }
  0x19   : > { %2592 = vmatpush3.bf16.msra.mxu0 %v2878_v3 }
  0x1a   : > { %2593 = vmatprep.subr.bf16.mxu0 %v2879_v6  ;;  %2616 = vmatpush3.bf16.msra.mxu1 %v2894_v11 }
  0x1b   : > { %2617 = vmatprep.subr.bf16.mxu1 %v2896_v21 }
  0x1d   : > { %2594 = vmatpush3.bf16.msra.mxu0 %v2879_v6 }
  0x1e   : > { %2595 = vmatprep.subr.bf16.mxu0 %v2880_v9  ;;  %2618 = vmatpush3.bf16.msra.mxu1 %v2896_v21 }
  0x1f   : > { %2619 = vmatprep.subr.bf16.mxu1 %v2898_v23 }
  0x21   : > { %2596 = vmatpush3.bf16.msra.mxu0 %v2880_v9 }
  0x22   : > { %2597 = vmatprep.subr.bf16.mxu0 %v2881_v10  ;;  %2620 = vmatpush3.bf16.msra.mxu1 %v2898_v23 }
  0x23   : > { %2621 = vmatprep.subr.bf16.mxu1 %v2900_v25 }
  0x25   : > { %2598 = vmatpush3.bf16.msra.mxu0 %v2881_v10 }
  0x26   : > { %2599 = vmatprep.subr.bf16.mxu0 %v2882_v12  ;;  %2622 = vmatpush3.bf16.msra.mxu1 %v2900_v25 }
  0x27   : > { %2623 = vmatprep.subr.bf16.mxu1 %v2902_v27 }
  0x29   : > { %2600 = vmatpush3.bf16.msra.mxu0 %v2882_v12 }
  0x2a   : > { %2633 = vmatprep.subr.bf16.mxu0 %v2887_v15  ;;  %2624 = vmatpush3.bf16.msra.mxu1 %v2902_v27 }
  0x2b   : > { %2657 = vmatprep.subr.bf16.mxu1 %v3128_v29 }
  0x2c   : > { %2602 = vmatmul.mubr.bf16.vlgmr.msra.gmra.mxu0 %v282_v13 }
  0x2d   : > { %2605 = vmatprep.mubr.bf16.mxu0 %v284_v14  ;;  %2634 = vmatpush3.bf16.msra.mxu0 %v2887_v15 }
  0x2e   : > { %2635 = vmatprep.subr.bf16.mxu0 %v2889_v16 }
  0x31   : > { %2636 = vmatpush3.bf16.msra.mxu0 %v2889_v16 }
  0x32   : > { %2637 = vmatprep.subr.bf16.mxu0 %v2891_v18 }
  0x34   : > { %2606 = vmatmul.mubr.bf16.gmra.mxu0 %v286_v17 }
  0x35   : > { %2638 = vmatpush3.bf16.msra.mxu0 %v2891_v18 }
  0x36   : > { %2639 = vmatprep.subr.bf16.mxu0 %v2893_v19 }
  0x39   : > { %2640 = vmatpush3.bf16.msra.mxu0 %v2893_v19 }
  0x3a   : > { %2641 = vmatprep.subr.bf16.mxu0 %v2895_v20 }
  0x3d   : > { %2642 = vmatpush3.bf16.msra.mxu0 %v2895_v20 }
  0x3e   : > { %2643 = vmatprep.subr.bf16.mxu0 %v2897_v22 }
  0x41   : > { %2644 = vmatpush3.bf16.msra.mxu0 %v2897_v22 }
  0x42   : > { %2645 = vmatprep.subr.bf16.mxu0 %v2899_v24 }
  0x45   : > { %2646 = vmatpush3.bf16.msra.mxu0 %v2899_v24  ;;  %v2907_v24 = vld [vmem:[%s3646_s3 + $0xe8] sm:$0xff]  }
  0x46   : > { %2647 = vmatprep.subr.bf16.mxu0 %v2901_v26 }
  0x49   : > { %2648 = vmatpush3.bf16.msra.mxu0 %v2901_v26 }
  0x4a   : > { %2681 = vmatprep.subr.bf16.mxu0 %v3122_v28 }
  0xec   : > { %v2603_v31 = vpop.f32.mrf.mxu0 }
  0xed   : > { %v426_v32 = vadd.f32 %v2603_v31, %v2129_v30 }
  0xee   : > { %v417_v33 = vpop.f32.mrf.mxu0 }
  0xef   : > { %v450_v34 = vmax.f32 %v426_v32, 0.0  ;;  %v418_v35 = vadd.f32 %v2129_v30, %v417_v33 }
  0xf0   : > { %v2604_v36 = vpop.f32.mrf.mxu0 }
  0xf1   : > { %v448_v37 = vmax.f32 %v418_v35, 0.0  ;;  %v429_v38 = vadd.f32 %v2604_v36, %v2129_v30  ;;  %v3139_v40 = vrot.slane %v450_v34, 7 }
  0xf2   : > { %v420_v41 = vpop.f32.mrf.mxu0 }
  0xf3   : > { %v3141_v42 = vrot.slane %v448_v37, 7  ;;  %v451_v43 = vmax.f32 %v429_v38, 0.0  ;;  %v421_v44 = vadd.f32 %v2129_v30, %v420_v41  ;;  %v3154_v50 = vsel %vm488_vm0, 0.0, %v3139_v40  ;;  %v2906_v37 = vld [vmem:[%s3646_s3 + $0xb0] sm:$0xff]  }
  0xf4   : > { %v2607_v45 = vpop.f32.mrf.mxu0  ;;  %v3162_v54 = vsel %vm488_vm0, %v3139_v40, 0.0  ;;  %v549_v1 = vrot.slane %v3154_v50, 1 }
  0xf5   : > { %v442_v46 = vadd.f32 %v2607_v45, %v2129_v30  ;;  %v2176_v48 = vpack.c.bf16 %v3141_v42, %v2984_v47  ;;  %v3150_v49 = vsel %vm488_vm0, 0.0, %v3141_v42  ;;  %v449_v51 = vmax.f32 %v421_v44, 0.0 }
  0xf6   : > { %v433_v52 = vpop.f32.mrf.mxu0  ;;  %v3158_v53 = vsel %vm488_vm0, %v3141_v42, 0.0  ;;  %v3164_v55 = vrot.slane %v451_v43, 7  ;;  %v543_v60 = vrot.slane %v3150_v49, 1  ;;  %v550_v11 = vrot.slane %v3162_v54, 1 }
  0xf7   : > { %v454_v56 = vmax.f32 %v442_v46, 0.0  ;;  %2649 = vmatprep.mubr.msk.bf16.mxu0 %vm2175_vm3, %v2176_v48  ;;  %v3166_v57 = vrot.slane %v449_v51, 7  ;;  %v434_v58 = vadd.f32 %v2129_v30, %v433_v52  ;;  %v544_v61 = vrot.slane %v3158_v53, 1 }
  0xf8   : > { %v2608_v59 = vpop.f32.mrf.mxu0  ;;  %v3198_v8 = vsel %vm488_vm0, 0.0, %v3164_v55  ;;  %v3215_v16 = vsel %vm488_vm0, %v3164_v55, 0.0  ;;  %v822_v19 = vrot.slane %v3150_v49, 2  ;;  %v823_v43 = vrot.slane %v3158_v53, 2  ;;  %v2909_v49 = vld [vmem:[%s3646_s3 + $0xe0] sm:$0xff]  }
  0xf9   : > { %v445_v63 = vadd.f32 %v2608_v59, %v2129_v30  ;;  %v3183_v2 = vpack.c.bf16 %v3139_v40, %v3166_v57  ;;  %v452_v3 = vmax.f32 %v434_v58, 0.0  ;;  %v3187_v5 = vsel %vm488_vm0, 0.0, %v3166_v57  ;;  %v2908_v59 = vld [vmem:[%s3646_s3 + $0xa8] sm:$0xff]  }
  0xfa   : > { %v436_v4 = vpop.f32.mrf.mxu0  ;;  %v3191_v6 = vsel %vm488_vm0, %v3166_v57, 0.0  ;;  %v3200_v9 = vrot.slane %v454_v56, 7  ;;  %v3206_v13 = vsel %vm540_vm5, %v543_v60, %v544_v61  ;;  %v546_v14 = vrot.slane %v3187_v5, 1 }
  0xfb   : > { %v437_v10 = vadd.f32 %v2129_v30, %v436_v4  ;;  %v3203_v12 = vrot.slane %v452_v3, 7  ;;  %v547_v15 = vrot.slane %v3191_v6, 1  ;;  %2650 = vmatmul.mubr.msk.bf16.vlgmr.msra.gmra.mxu0 %vm3173_vm4, %v3183_v2  ;;  %v572_v18 = vpack.c.bf16 %v3206_v13, %v3178_v0  ;;  %v2910_v4 = vld [vmem:[%s3646_s3 + $0xa0] sm:$0xff]  }
  0xfc   : > { %2682 = vmatpush3.bf16.msra.mxu0 %v3122_v28  ;;  %v455_v22 = vmax.f32 %v445_v63, 0.0  ;;  %v3237_v25 = vsel %vm488_vm0, 0.0, %v3200_v9  ;;  %v3241_v26 = vsel %vm488_vm0, %v3200_v9, 0.0  ;;  %v552_v28 = vrot.slane %v3198_v8, 1 }
  0xfd   : > { %v453_v17 = vmax.f32 %v437_v10, 0.0  ;;  %v3223_v20 = vsel %vm488_vm0, 0.0, %v3203_v12  ;;  %v3227_v21 = vsel %vm488_vm0, %v3203_v12, 0.0  ;;  %v3230_v23 = vsel %vm540_vm5, %v546_v14, %v547_v15  ;;  %2683 = vmatprep.subr.bf16.mxu0 %v2905_v7  ;;  %2625 = vmatprep.mubr.bf16.mxu1 %v572_v18  ;;  %v2913_v10 = vld [vmem:[%s3646_s3 + $0xd0] sm:$0xff]   ;;  %v2912_v18 = vld [vmem:[%s3646_s3 + $0x98] sm:$0xff]  }
  0xfe   : > { %v3247_v30 = vsel %vm540_vm5, %v549_v1, %v550_v11  ;;  %v3251_v31 = vpack.c.bf16 %v3203_v12, %v3164_v55  ;;  %v553_v32 = vrot.slane %v3215_v16, 1  ;;  %v555_v33 = vrot.slane %v3223_v20, 1 }
  0xff   : > { %v3243_v27 = vrot.slane %v453_v17, 7  ;;  %v3265_v36 = vpack.c.bf16 %v3247_v30, %v3230_v23  ;;  %v556_v38 = vrot.slane %v3227_v21, 1  ;;  %v3271_v41 = vrot.slane %v455_v22, 7  ;;  %v2915_v22 = vld [vmem:[%s3646_s3 + $0xc8] sm:$0xff]  }
 0x100   : > { %2684 = vmatpush3.bf16.msra.mxu0 %v2905_v7  ;;  %2653 = vmatprep.mubr.msk.bf16.mxu0 %vm3173_vm4, %v3251_v31  ;;  %v3284_v46 = vsel %vm540_vm5, %v552_v28, %v553_v32  ;;  %v561_v52 = vrot.slane %v3237_v25, 1  ;;  %v2244_v56 = vpack.c.bf16 %v3166_v57, %v3141_v42  ;;  %v562_v58 = vrot.slane %v3241_v26, 1  ;;  %v2911_v57 = vld [vmem:[%s3646_s3 + $0xd8] sm:$0xff]  }
 0x101   : > { %v3257_v34 = vsel %vm488_vm0, 0.0, %v3243_v27  ;;  %v3261_v35 = vsel %vm488_vm0, %v3243_v27, 0.0  ;;  %2685 = vmatprep.subr.bf16.mxu0 %v2907_v24  ;;  %v3279_v44 = vpack.c.bf16 %v3200_v9, %v3243_v27  ;;  %2626 = vmatmul.mubr.bf16.vlgmr.msra.gmra.mxu1 %v3265_v36  ;;  %v3287_v48 = vsel %vm540_vm5, %v555_v33, %v556_v38  ;;  %v2917_v38 = vld [vmem:[%s3646_s3 + $0xc0] sm:$0xff]  }
 0x102   : > { %v558_v45 = vrot.slane %v3257_v34, 1  ;;  %v559_v51 = vrot.slane %v3261_v35, 1  ;;  %2658 = vmatpush3.bf16.msra.mxu1 %v3128_v29  ;;  %v3297_v53 = vpack.c.bf16 %v3287_v48, %v3284_v46  ;;  %v3315_v60 = vsel %vm540_vm5, %v561_v52, %v562_v58 }
 0x103   : > { %2654 = vmatmul.mubr.msk.bf16.gmra.mxu0 %vm3173_vm4, %v3279_v44  ;;  %2659 = vmatprep.subr.bf16.mxu1 %v2906_v37  ;;  %v3318_v42 = vrot.slane %v2984_v47, 2  ;;  %v496_v61 = vsel %vm488_vm0, 0.0, %v3271_v41  ;;  %v3330_v1 = vsel %vm819_vm6, %v822_v19, %v823_v43  ;;  %v504_v3 = vsel %vm488_vm0, %v3271_v41, 0.0  ;;  %v2916_v43 = vld [vmem:[%s3646_s3 + $0x88] sm:$0xff]  }
 0x104   : > { %2686 = vmatpush3.bf16.msra.mxu0 %v2907_v24  ;;  %v3309_v29 = vsel %vm540_vm5, %v558_v45, %v559_v51  ;;  %2629 = vmatprep.mubr.bf16.mxu1 %v3297_v53  ;;  %v1283_v11 = vrot.slane %v496_v61, 2  ;;  %v1284_v14 = vrot.slane %v504_v3, 2  ;;  %v1137_v15 = vrot.slane %v496_v61, 1  ;;  %v2919_v45 = vld [vmem:[%s3646_s3 + $0x178] sm:$0xff]  }
 0x105   : > { %2697 = vmatprep.mubr.msk.bf16.mxu0 %vm3173_vm4, %v2244_v56  ;;  %2687 = vmatprep.subr.bf16.mxu0 %v2909_v49  ;;  %v3327_v63 = vpack.c.bf16 %v3315_v60, %v3309_v29  ;;  %v851_v7 = vpack.c.bf16 %v3330_v1, %v3318_v42  ;;  %v1138_v17 = vrot.slane %v504_v3, 1  ;;  %v2249_v51 = vpack.c.bf16 %v3164_v55, %v3139_v40  ;;  %v2920_v55 = vld [vmem:[%s3646_s3 + $0x138] sm:$0xff]  }
 0x106   : > { %2660 = vmatpush3.bf16.msra.mxu1 %v2906_v37  ;;  %v3347_v19 = vsel %vm819_vm6, %v1283_v11, %v1284_v14  ;;  %v2914_v37 = vld [vmem:[%s3646_s3 + $0x90] sm:$0xff]   ;;  %v825_v52 = vrot.slane %v3187_v5, 2  ;;  %v826_v56 = vrot.slane %v3191_v6, 2  ;;  %v2254_v58 = vpack.c.bf16 %v3243_v27, %v3203_v12  ;;  %v2923_v12 = vld [vmem:[%s3646_s3 + $0x168] sm:$0xff]  }
 0x107   : > { %2661 = vmatprep.subr.bf16.mxu1 %v2908_v59  ;;  %v3353_v24 = vsel %vm540_vm5, %v1137_v15, %v1138_v17  ;;  %v1707_v28 = vpack.c.bf16 %v3318_v42, %v3347_v19  ;;  %v835_v61 = vrot.slane %v3227_v21, 2  ;;  %v828_v3 = vrot.slane %v3154_v50, 2  ;;  %v2926_v17 = vld [vmem:[%s3646_s3 + $0x120] sm:$0xff]  }
 0x108   : > { %2688 = vmatpush3.bf16.msra.mxu0 %v2909_v49  ;;  %v1144_v32 = vpack.c.bf16 %v3353_v24, %v3315_v60  ;;  %v1568_v33 = vpack.c.bf16 %v3178_v0, %v3353_v24  ;;  %v2918_v49 = vld [vmem:[%s3646_s3 + $0x80] sm:$0xff]   ;;  %v829_v40 = vrot.slane %v3162_v54, 2  ;;  %v831_v5 = vrot.slane %v3198_v8, 2  ;;  %v2947_v60 = vld [vmem:[%s3646_s3 + $0x1c8] sm:$0xff]   ;;  %v2955_v0 = vld [vmem:[%s3646_s3 + $0x218] sm:$0xff]  }
 0x109   : > { %2689 = vmatprep.subr.bf16.mxu0 %v2911_v57  ;;  %2630 = vmatmul.mubr.bf16.gmra.mxu1 %v3327_v63  ;;  %v832_v6 = vrot.slane %v3215_v16, 2  ;;  %v827_v50 = vsel %vm819_vm6, %v825_v52, %v826_v56  ;;  %v2922_v16 = vld [vmem:[%s3646_s3 + $0x130] sm:$0xff]   ;;  %v837_v27 = vrot.slane %v3257_v34, 2  ;;  %v841_v11 = vrot.slane %v3241_v26, 2  ;;  %v2925_v34 = vld [vmem:[%s3646_s3 + $0x160] sm:$0xff]   ;;  %v2961_v24 = vld [vmem:[%s3648_s5 + $0x28] sm:$0xff]  }
 0x10a   : > { %2662 = vmatpush3.bf16.msra.mxu1 %v2908_v59  ;;  %2673 = vmatprep.mubr.bf16.mxu1 %v851_v7  ;;  %v2921_v59 = vld [vmem:[%s3646_s3 + $0x170] sm:$0xff]   ;;  %v838_v7 = vrot.slane %v3261_v35, 2  ;;  %v2259_v14 = vpack.c.bf16 %v3271_v41, %v3200_v9  ;;  %v1287_v15 = vpack.c.bf16 %v827_v50, %v3330_v1  ;;  %v2927_v35 = vld [vmem:[%s3646_s3 + $0x158] sm:$0xff]   ;;  %v2962_v42 = vld [vmem:[%s3648_s5 + $0x20] sm:$0xff]  }
 0x10b   : > { %2663 = vmatprep.subr.bf16.mxu1 %v2910_v4  ;;  %v833_v8 = vsel %vm819_vm6, %v831_v5, %v832_v6  ;;  %v2937_v52 = vld [vmem:[%s3646_s3 + $0x1f0] sm:$0xff]   ;;  %v2948_v5 = vld [vmem:[%s3646_s3 + $0x188] sm:$0xff]   ;;  %v2950_v6 = vld [vmem:[%s3646_s3 + $0x180] sm:$0xff]  }
 0x10c   : > { %2690 = vmatpush3.bf16.msra.mxu0 %v2911_v57  ;;  %v834_v57 = vrot.slane %v3223_v20, 2  ;;  %v3406_v20 = vsel %vm819_vm6, %v828_v3, %v829_v40  ;;  %v839_v9 = vsel %vm819_vm6, %v837_v27, %v838_v7  ;;  %v1143_v3 = vpack.c.bf16 %v3309_v29, %v3287_v48  ;;  %v2942_v48 = vld [vmem:[%s3646_s3 + $0x1a0] sm:$0xff]   ;;  %v2944_v29 = vld [vmem:[%s3646_s3 + $0x198] sm:$0xff]  }
 0x10d   : > { %2691 = vmatprep.subr.bf16.mxu0 %v2913_v10  ;;  %v3409_v21 = vpack.c.bf16 %v3406_v20, %v827_v50  ;;  %v2951_v50 = vld [vmem:[%s3646_s3 + $0x238] sm:$0xff]  }
 0x10e   : > { %2664 = vmatpush3.bf16.msra.mxu1 %v2910_v4  ;;  %v3400_v54 = vsel %vm819_vm6, %v834_v57, %v835_v61  ;;  %v1142_v57 = vpack.c.bf16 %v3284_v46, %v3247_v30  ;;  %v2938_v61 = vld [vmem:[%s3646_s3 + $0x1b0] sm:$0xff]   ;;  %v2940_v30 = vld [vmem:[%s3646_s3 + $0x1a8] sm:$0xff]   ;;  %v2943_v46 = vld [vmem:[%s3646_s3 + $0x1d8] sm:$0xff]  }
 0x10f   : > { %2665 = vmatprep.subr.bf16.mxu1 %v2912_v18  ;;  %v3417_v4 = vpack.c.bf16 %v3400_v54, %v833_v8  ;;  %v1289_v56 = vpack.c.bf16 %v839_v9, %v3400_v54  ;;  %v2952_v54 = vld [vmem:[%s3646_s3 + $0x230] sm:$0xff]  }
 0x110   : > { %2692 = vmatpush3.bf16.msra.mxu0 %v2913_v10  ;;  %v840_v10 = vrot.slane %v3237_v25, 2  ;;  %v2924_v25 = vld [vmem:[%s3646_s3 + $0x128] sm:$0xff]  }
 0x111   : > { %2693 = vmatprep.subr.bf16.mxu0 %v2915_v22 }
 0x112   : > { %2666 = vmatpush3.bf16.msra.mxu1 %v2912_v18  ;;  %v842_v26 = vsel %vm819_vm6, %v840_v10, %v841_v11  ;;  %v1141_v18 = vpack.c.bf16 %v3230_v23, %v3206_v13  ;;  %v2931_v13 = vld [vmem:[%s3646_s3 + $0x148] sm:$0xff]   ;;  %v2930_v23 = vld [vmem:[%s3646_s3 + $0x110] sm:$0xff]  }
 0x113   : > { %2667 = vmatprep.subr.bf16.mxu1 %v2914_v37  ;;  %v3440_v1 = vpack.c.bf16 %v842_v26, %v839_v9  ;;  %v1290_v40 = vpack.c.bf16 %v3347_v19, %v842_v26  ;;  %v2963_v19 = vld [vmem:[%s3648_s5 + $0x18] sm:$0xff]  }
 0x114   : > { %2694 = vmatpush3.bf16.msra.mxu0 %v2915_v22  ;;  %v2929_v22 = vld [vmem:[%s3646_s3 + $0x150] sm:$0xff]  }
 0x115   : > { %2695 = vmatprep.subr.bf16.mxu0 %v2917_v38 }
 0x116   : > { %2668 = vmatpush3.bf16.msra.mxu1 %v2914_v37  ;;  %v2928_v37 = vld [vmem:[%s3646_s3 + $0x118] sm:$0xff]  }
 0x117   : > { %2669 = vmatprep.subr.bf16.mxu1 %v2916_v43 }
 0x118   : > { %2696 = vmatpush3.bf16.msra.mxu0 %v2917_v38  ;;  %v2933_v38 = vld [vmem:[%s3646_s3 + $0x140] sm:$0xff]  }
 0x119   : > { %2729 = vmatprep.subr.bf16.mxu0 %v2919_v45 }
 0x11a   : > { %2670 = vmatpush3.bf16.msra.mxu1 %v2916_v43  ;;  %v2932_v43 = vld [vmem:[%s3646_s3 + $0x108] sm:$0xff]  }
 0x11b   : > { %2698 = vmatmul.mubr.msk.bf16.vlgmr.msra.gmra.mxu0 %vm3173_vm4, %v2249_v51  ;;  %2671 = vmatprep.subr.bf16.mxu1 %v2918_v49  ;;  %v1288_v51 = vpack.c.bf16 %v833_v8, %v3406_v20  ;;  %v2965_v20 = vld [vmem:[%s3648_s5 + $0x8] sm:$0xff]   ;;  %v2966_v8 = vld [vmem:[%s3648_s5] sm:$0xff]  }
 0x11c   : > { %2701 = vmatprep.mubr.msk.bf16.mxu0 %vm3173_vm4, %v2254_v58  ;;  %2730 = vmatpush3.bf16.msra.mxu0 %v2919_v45  ;;  %v2935_v45 = vld [vmem:[%s3646_s3 + $0x1f8] sm:$0xff]  }
 0x11d   : > { %2731 = vmatprep.subr.bf16.mxu0 %v2921_v59  ;;  %v2936_v58 = vld [vmem:[%s3646_s3 + $0x1b8] sm:$0xff]  }
 0x11e   : > { %2672 = vmatpush3.bf16.msra.mxu1 %v2918_v49  ;;  %v2934_v49 = vld [vmem:[%s3646_s3 + $0x100] sm:$0xff]  }
 0x11f   : > { %2705 = vmatprep.subr.bf16.mxu1 %v2920_v55 }
 0x120   : > { %2732 = vmatpush3.bf16.msra.mxu0 %v2921_v59  ;;  %v2939_v59 = vld [vmem:[%s3646_s3 + $0x1e8] sm:$0xff]  }
 0x121   : > { %2674 = vmatmul.mubr.bf16.vlgmr.msra.gmra.mxu1 %v3409_v21  ;;  %2733 = vmatprep.subr.bf16.mxu0 %v2923_v12 }
 0x122   : > { %2677 = vmatprep.mubr.bf16.mxu1 %v3417_v4  ;;  %2706 = vmatpush3.bf16.msra.mxu1 %v2920_v55  ;;  %v2941_v55 = vld [vmem:[%s3646_s3 + $0x1e0] sm:$0xff]  }
 0x123   : > { %2702 = vmatmul.mubr.msk.bf16.gmra.mxu0 %vm3173_vm4, %v2259_v14  ;;  %2707 = vmatprep.subr.bf16.mxu1 %v2922_v16 }
 0x124   : > { %2734 = vmatpush3.bf16.msra.mxu0 %v2923_v12  ;;  %2745 = vmatprep.mubr.bf16.mxu0 %v1287_v15 }
 0x125   : > { %2735 = vmatprep.subr.bf16.mxu0 %v2925_v34 }
 0x126   : > { %2708 = vmatpush3.bf16.msra.mxu1 %v2922_v16 }
 0x127   : > { %2709 = vmatprep.subr.bf16.mxu1 %v2924_v25 }
 0x128   : > { %2736 = vmatpush3.bf16.msra.mxu0 %v2925_v34 }
 0x129   : > { %2678 = vmatmul.mubr.bf16.gmra.mxu1 %v3440_v1  ;;  %2737 = vmatprep.subr.bf16.mxu0 %v2927_v35 }
 0x12a   : > { %2710 = vmatpush3.bf16.msra.mxu1 %v2924_v25  ;;  %2721 = vmatprep.mubr.bf16.mxu1 %v1141_v18 }
 0x12b   : > { %2711 = vmatprep.subr.bf16.mxu1 %v2926_v17 }
 0x12c   : > { %2738 = vmatpush3.bf16.msra.mxu0 %v2927_v35 }
 0x12d   : > { %2739 = vmatprep.subr.bf16.mxu0 %v2929_v22 }
 0x12e   : > { %2712 = vmatpush3.bf16.msra.mxu1 %v2926_v17 }
 0x12f   : > { %2713 = vmatprep.subr.bf16.mxu1 %v2928_v37 }
 0x130   : > { %2740 = vmatpush3.bf16.msra.mxu0 %v2929_v22 }
 0x131   : > { %2741 = vmatprep.subr.bf16.mxu0 %v2931_v13 }
 0x132   : > { %2714 = vmatpush3.bf16.msra.mxu1 %v2928_v37 }
 0x133   : > { %2715 = vmatprep.subr.bf16.mxu1 %v2930_v23 }
 0x134   : > { %2742 = vmatpush3.bf16.msra.mxu0 %v2931_v13 }
 0x135   : > { %2743 = vmatprep.subr.bf16.mxu0 %v2933_v38 }
 0x136   : > { %2716 = vmatpush3.bf16.msra.mxu1 %v2930_v23 }
 0x137   : > { %2717 = vmatprep.subr.bf16.mxu1 %v2932_v43 }
 0x138   : > { %2744 = vmatpush3.bf16.msra.mxu0 %v2933_v38 }
 0x139   : > { %2777 = vmatprep.subr.bf16.mxu0 %v2935_v45 }
 0x13a   : > { %2718 = vmatpush3.bf16.msra.mxu1 %v2932_v43 }
 0x13b   : > { %2719 = vmatprep.subr.bf16.mxu1 %v2934_v49  ;;  %2746 = vmatmul.mubr.bf16.vlgmr.msra.gmra.mxu0 %v1288_v51 }
 0x13c   : > { %2749 = vmatprep.mubr.bf16.mxu0 %v1289_v56  ;;  %2778 = vmatpush3.bf16.msra.mxu0 %v2935_v45 }
 0x13d   : > { %2779 = vmatprep.subr.bf16.mxu0 %v2937_v52 }
 0x13e   : > { %2720 = vmatpush3.bf16.msra.mxu1 %v2934_v49 }
 0x13f   : > { %2753 = vmatprep.subr.bf16.mxu1 %v2936_v58 }
 0x140   : > { %2780 = vmatpush3.bf16.msra.mxu0 %v2937_v52 }
 0x141   : > { %2722 = vmatmul.mubr.bf16.vlgmr.msra.gmra.mxu1 %v1142_v57  ;;  %2781 = vmatprep.subr.bf16.mxu0 %v2939_v59 }
 0x142   : > { %2725 = vmatprep.mubr.bf16.mxu1 %v1143_v3  ;;  %2754 = vmatpush3.bf16.msra.mxu1 %v2936_v58 }
 0x143   : > { %2750 = vmatmul.mubr.bf16.gmra.mxu0 %v1290_v40  ;;  %2755 = vmatprep.subr.bf16.mxu1 %v2938_v61 }
 0x144   : > { %2782 = vmatpush3.bf16.msra.mxu0 %v2939_v59  ;;  %2793 = vmatprep.mubr.bf16.mxu0 %v3265_v36  ;;  %v2945_v36 = vld [vmem:[%s3646_s3 + $0x1d0] sm:$0xff]  }
 0x145   : > { %2783 = vmatprep.subr.bf16.mxu0 %v2941_v55 }
 0x146   : > { %2756 = vmatpush3.bf16.msra.mxu1 %v2938_v61 }
 0x147   : > { %2757 = vmatprep.subr.bf16.mxu1 %v2940_v30 }
 0x148   : > { %2784 = vmatpush3.bf16.msra.mxu0 %v2941_v55 }
 0x149   : > { %2726 = vmatmul.mubr.bf16.gmra.mxu1 %v1144_v32  ;;  %2785 = vmatprep.subr.bf16.mxu0 %v2943_v46  ;;  %v2946_v32 = vld [vmem:[%s3646_s3 + $0x190] sm:$0xff]  }
 0x14a   : > { %2758 = vmatpush3.bf16.msra.mxu1 %v2940_v30  ;;  %2769 = vmatprep.mubr.msk.bf16.mxu1 %vm3173_vm4, %v3183_v2  ;;  %v2949_v2 = vld [vmem:[%s3646_s3 + $0x1c0] sm:$0xff]  }
 0x14b   : > { %2759 = vmatprep.subr.bf16.mxu1 %v2942_v48 }
 0x14c   : > { %2786 = vmatpush3.bf16.msra.mxu0 %v2943_v46 }
 0x14d   : > { %2787 = vmatprep.subr.bf16.mxu0 %v2945_v36 }
 0x14e   : > { %2760 = vmatpush3.bf16.msra.mxu1 %v2942_v48 }
 0x14f   : > { %2761 = vmatprep.subr.bf16.mxu1 %v2944_v29 }
 0x150   : > { %2788 = vmatpush3.bf16.msra.mxu0 %v2945_v36 }
 0x151   : > { %2789 = vmatprep.subr.bf16.mxu0 %v2947_v60 }
 0x152   : > { %2762 = vmatpush3.bf16.msra.mxu1 %v2944_v29 }
 0x153   : > { %2763 = vmatprep.subr.bf16.mxu1 %v2946_v32 }
 0x154   : > { %2790 = vmatpush3.bf16.msra.mxu0 %v2947_v60 }
 0x155   : > { %2791 = vmatprep.subr.bf16.mxu0 %v2949_v2 }
 0x156   : > { %2764 = vmatpush3.bf16.msra.mxu1 %v2946_v32 }
 0x157   : > { %2765 = vmatprep.subr.bf16.mxu1 %v2948_v5 }
 0x158   : > { %2792 = vmatpush3.bf16.msra.mxu0 %v2949_v2 }
 0x15a   : > { %2766 = vmatpush3.bf16.msra.mxu1 %v2948_v5 }
 0x15b   : > { %2767 = vmatprep.subr.bf16.mxu1 %v2950_v6  ;;  %2794 = vmatmul.mubr.bf16.vlgmr.msra.gmra.mxu0 %v3297_v53  ;;  %v2953_v53 = vld [vmem:[%s3646_s3 + $0x228] sm:$0xff]  }
 0x15c   : > { %2797 = vmatprep.mubr.bf16.mxu0 %v3327_v63  ;;  %v2960_v63 = vld [vmem:[%s3648_s5 + $0x30] sm:$0xff]  }
 0x15e   : > { %2768 = vmatpush3.bf16.msra.mxu1 %v2950_v6 }
 0x15f   : > { %2801 = vmatprep.subr.bf16.mxu1 %v2951_v50 }
 0x161   : > { %2770 = vmatmul.mubr.msk.bf16.vlgmr.msra.gmra.mxu1 %vm3173_vm4, %v3251_v31  ;;  %v2350_v31 = vpack.c.bf16 %v2984_v47, %v3271_v41  ;;  %v2957_v47 = vld [vmem:[%s3646_s3 + $0x208] sm:$0xff]   ;;  %v2958_v41 = vld [vmem:[%s3646_s3 + $0x200] sm:$0xff]  }
 0x162   : > { %2773 = vmatprep.mubr.msk.bf16.mxu1 %vm3173_vm4, %v3279_v44  ;;  %2802 = vmatpush3.bf16.msra.mxu1 %v2951_v50  ;;  %v2959_v44 = vld [vmem:[%s3648_s5 + $0x38] sm:$0xff]  }
 0x163   : > { %2798 = vmatmul.mubr.bf16.gmra.mxu0 %v1568_v33  ;;  %2803 = vmatprep.subr.bf16.mxu1 %v2952_v54  ;;  %v2964_v33 = vld [vmem:[%s3648_s5 + $0x10] sm:$0xff]  }
 0x164   : > { %2825 = vmatprep.subr.bf16.mxu0 %v2959_v44 }
 0x165   : > { %2826 = vmatpush3.bf16.msra.mxu0 %v2959_v44 }
 0x166   : > { %2804 = vmatpush3.bf16.msra.mxu1 %v2952_v54  ;;  %2827 = vmatprep.subr.bf16.mxu0 %v2960_v63 }
 0x167   : > { %2805 = vmatprep.subr.bf16.mxu1 %v2953_v53 }
 0x169   : > { %2774 = vmatmul.mubr.msk.bf16.gmra.mxu1 %vm2349_vm7, %v2350_v31  ;;  %2828 = vmatpush3.bf16.msra.mxu0 %v2960_v63 }
 0x16a   : > { %2806 = vmatpush3.bf16.msra.mxu1 %v2953_v53  ;;  %2817 = vmatprep.mubr.bf16.mxu1 %v3409_v21 }
 0x16b   : > { %2807 = vmatprep.subr.bf16.mxu1 %v2954_v62  ;;  %2829 = vmatprep.subr.bf16.mxu0 %v2961_v24 }
 0x16d   : > { %2830 = vmatpush3.bf16.msra.mxu0 %v2961_v24 }
 0x16e   : > { %2808 = vmatpush3.bf16.msra.mxu1 %v2954_v62  ;;  %2831 = vmatprep.subr.bf16.mxu0 %v2962_v42 }
 0x16f   : > { %2809 = vmatprep.subr.bf16.mxu1 %v2955_v0 }
 0x171   : > { %2832 = vmatpush3.bf16.msra.mxu0 %v2962_v42 }
 0x172   : > { %2810 = vmatpush3.bf16.msra.mxu1 %v2955_v0  ;;  %2833 = vmatprep.subr.bf16.mxu0 %v2963_v19 }
 0x173   : > { %2811 = vmatprep.subr.bf16.mxu1 %v2956_v39 }
 0x175   : > { %2834 = vmatpush3.bf16.msra.mxu0 %v2963_v19 }
 0x176   : > { %2812 = vmatpush3.bf16.msra.mxu1 %v2956_v39  ;;  %2835 = vmatprep.subr.bf16.mxu0 %v2964_v33 }
 0x177   : > { %2813 = vmatprep.subr.bf16.mxu1 %v2957_v47 }
 0x179   : > { %2836 = vmatpush3.bf16.msra.mxu0 %v2964_v33 }
 0x17a   : > { %2814 = vmatpush3.bf16.msra.mxu1 %v2957_v47  ;;  %2837 = vmatprep.subr.bf16.mxu0 %v2965_v20 }
 0x17b   : > { %2815 = vmatprep.subr.bf16.mxu1 %v2958_v41 }
 0x17d   : > { %2838 = vmatpush3.bf16.msra.mxu0 %v2965_v20 }
 0x17e   : > { %2816 = vmatpush3.bf16.msra.mxu1 %v2958_v41  ;;  %2839 = vmatprep.subr.bf16.mxu0 %v2966_v8 }
 0x17f   : > { %2849 = vmatprep.subr.bf16.mxu1 %v2959_v44 }
 0x181   : > { %2818 = vmatmul.mubr.bf16.vlgmr.msra.gmra.mxu1 %v3417_v4  ;;  %2840 = vmatpush3.bf16.msra.mxu0 %v2966_v8 }
 0x182   : > { %2821 = vmatprep.mubr.bf16.mxu1 %v3440_v1  ;;  %2857 = vmatpush3.bf16.msra.mxu1 %v2959_v44 }
 0x183   : > { %2850 = vmatprep.subr.bf16.mxu1 %v2960_v63 }
 0x186   : > { %2858 = vmatpush3.bf16.msra.mxu1 %v2960_v63 }
 0x187   : > { %2851 = vmatprep.subr.bf16.mxu1 %v2961_v24 }
 0x189   : > { %2822 = vmatmul.mubr.bf16.gmra.mxu1 %v1707_v28 }
 0x18a   : > { %2859 = vmatpush3.bf16.msra.mxu1 %v2961_v24 }
 0x18b   : > { %2852 = vmatprep.subr.bf16.mxu1 %v2962_v42 }
 0x18e   : > { %2860 = vmatpush3.bf16.msra.mxu1 %v2962_v42 }
 0x18f   : > { %2853 = vmatprep.subr.bf16.mxu1 %v2963_v19 }
 0x192   : > { %2861 = vmatpush3.bf16.msra.mxu1 %v2963_v19 }
 0x193   : > { %2854 = vmatprep.subr.bf16.mxu1 %v2964_v33 }
 0x196   : > { %2862 = vmatpush3.bf16.msra.mxu1 %v2964_v33 }
 0x197   : > { %2855 = vmatprep.subr.bf16.mxu1 %v2965_v20 }
 0x19a   : > { %2863 = vmatpush3.bf16.msra.mxu1 %v2965_v20 }
 0x19b   : > { %2856 = vmatprep.subr.bf16.mxu1 %v2966_v8 }
 0x19e   : > { %2864 = vmatpush3.bf16.msra.mxu1 %v2966_v8 }
 0x1bb   : > { %v2651_v27 = vpop.f32.mrf.mxu0 }
 0x1bd   : > { %v788_v7 = vpop.f32.mrf.mxu0 }
 0x1bf   : > { %v2652_v11 = vpop.f32.mrf.mxu0 }
 0x1c1   : > { %v3592_v28 = vpop.f32.mrf.mxu1  ;;  %v791_v34 = vpop.f32.mrf.mxu0 }
 0x1c2   : > { %v797_v39 = vadd.f32 %v2651_v27, %v3592_v28 }
 0x1c3   : > { %v3597_v12 = vpop.f32.mrf.mxu1  ;;  %v2655_v25 = vpop.f32.mrf.mxu0 }
 0x1c4   : > { %v789_v0 = vadd.f32 %v788_v7, %v3597_v12 }
 0x1c5   : > { %v2628_v21 = vpop.f32.mrf.mxu1  ;;  %v804_v26 = vpop.f32.mrf.mxu0 }
 0x1c6   : > { %v800_v41 = vadd.f32 %v2652_v11, %v2628_v21 }
 0x1c7   : > { %v678_v16 = vpop.f32.mrf.mxu1  ;;  %v2656_v1 = vpop.f32.mrf.mxu0 }
 0x1c8   : > { %v792_v42 = vadd.f32 %v791_v34, %v678_v16 }
 0x1c9   : > { %v3605_v4 = vpop.f32.mrf.mxu1  ;;  %v807_v18 = vpop.f32.mrf.mxu0 }
 0x1ca   : > { %v813_v7 = vadd.f32 %v2655_v25, %v3605_v4 }
 0x1cb   : > { %v691_v10 = vpop.f32.mrf.mxu1 }
 0x1cd   : > { %v3607_v14 = vpop.f32.mrf.mxu1 }
 0x1ce   : > { %3655 = vst [vmem:[#allocation2_spill] sm:$0xff] %v3607_v14 }
 0x1cf   : > { %v3609_v15 = vpop.f32.mrf.mxu1 }
 0x1d0   : > { %3656 = vst [vmem:[#allocation3_spill] sm:$0xff] %v3609_v15  ;;  %v805_v15 = vadd.f32 %v804_v26, %v691_v10 }
 0x1d5   : > { %v3660_v28 = vld [vmem:[#allocation2_spill] sm:$0xff] }
 0x1d6   : > { %v816_v11 = vadd.f32 %v2656_v1, %v3660_v28 }
 0x1db   : > { %v2699_v37 = vpop.f32.mrf.mxu0 }
 0x1dd   : > { %v1096_v23 = vpop.f32.mrf.mxu0 }
 0x1df   : > { %v2700_v43 = vpop.f32.mrf.mxu0 }
 0x1e1   : > { %v2675_v9 = vpop.f32.mrf.mxu1  ;;  %v1099_v49 = vpop.f32.mrf.mxu0 }
 0x1e2   : > { %v987_v63 = vadd.f32 %v2675_v9, %v797_v39 }
 0x1e3   : > { %v954_v35 = vpop.f32.mrf.mxu1  ;;  %v2703_v52 = vpop.f32.mrf.mxu0 }
 0x1e4   : > { %v985_v44 = vadd.f32 %v954_v35, %v789_v0  ;;  %v3661_v0 = vld [vmem:[#allocation3_spill] sm:$0xff] }
 0x1e5   : > { %v2676_v17 = vpop.f32.mrf.mxu1  ;;  %v1112_v58 = vpop.f32.mrf.mxu0  ;;  %v808_v16 = vadd.f32 %v807_v18, %v3661_v0 }
 0x1e6   : > { %v988_v19 = vadd.f32 %v2676_v17, %v800_v41  ;;  %v1127_v8 = vadd.f32 %v1096_v23, %v985_v44 }
 0x1e7   : > { %v957_v22 = vpop.f32.mrf.mxu1  ;;  %v2704_v57 = vpop.f32.mrf.mxu0 }
 0x1e8   : > { %v986_v20 = vadd.f32 %v957_v22, %v792_v42 }
 0x1e9   : > { %v2679_v13 = vpop.f32.mrf.mxu1  ;;  %v1115_v3 = vpop.f32.mrf.mxu0 }
 0x1ea   : > { %v1128_v9 = vadd.f32 %v1099_v49, %v986_v20  ;;  %v991_v34 = vadd.f32 %v2679_v13, %v813_v7 }
 0x1eb   : > { %v970_v38 = vpop.f32.mrf.mxu1 }
 0x1ec   : > { %v989_v21 = vadd.f32 %v970_v38, %v805_v15  ;;  %v1133_v25 = vadd.f32 %v2703_v52, %v991_v34 }
 0x1ed   : > { %v2680_v45 = vpop.f32.mrf.mxu1 }
 0x1ee   : > { %v992_v22 = vadd.f32 %v2680_v45, %v816_v11 }
 0x1ef   : > { %v973_v51 = vpop.f32.mrf.mxu1 }
 0x1f0   : > { %v990_v39 = vadd.f32 %v973_v51, %v808_v16  ;;  %v1134_v15 = vadd.f32 %v2704_v57, %v992_v22 }
 0x1f2   : > { %v1132_v18 = vadd.f32 %v1115_v3, %v990_v39  ;;  %v2400_v3 = vld [vmem:[%s3647_s4] ss:$0 sm:$0xff] }
 0x1fb   : > { %v2747_v55 = vpop.f32.mrf.mxu0 }
 0x1fd   : > { %v1390_v46 = vpop.f32.mrf.mxu0 }
 0x1ff   : > { %v2748_v36 = vpop.f32.mrf.mxu0 }
 0x201   : > { %v2723_v56 = vpop.f32.mrf.mxu1  ;;  %v1393_v60 = vpop.f32.mrf.mxu0 }
 0x203   : > { %v1244_v59 = vpop.f32.mrf.mxu1  ;;  %v3611_v2 = vpop.f32.mrf.mxu0 }
 0x204   : > { %3657 = vst [vmem:[#allocation4_spill] sm:$0xff] %v3611_v2  ;;  %v1129_v2 = vadd.f32 %v2699_v37, %v987_v63  ;;  %v1275_v14 = vadd.f32 %v1244_v59, %v1127_v8 }
 0x205   : > { %v2724_v61 = vpop.f32.mrf.mxu1  ;;  %v1406_v6 = vpop.f32.mrf.mxu0 }
 0x206   : > { %v1277_v12 = vadd.f32 %v2723_v56, %v1129_v2  ;;  %v1421_v37 = vadd.f32 %v1390_v46, %v1275_v14 }
 0x207   : > { %v1247_v40 = vpop.f32.mrf.mxu1  ;;  %v3613_v54 = vpop.f32.mrf.mxu0 }
 0x208   : > { %3658 = vst [vmem:[#allocation5_spill] sm:$0xff] %v3613_v54  ;;  %v1276_v23 = vadd.f32 %v1247_v40, %v1128_v9  ;;  %v1423_v10 = vadd.f32 %v2747_v55, %v1277_v12 }
 0x209   : > { %v2727_v30 = vpop.f32.mrf.mxu1  ;;  %v3615_v31 = vpop.f32.mrf.mxu0 }
 0x20a   : > { %3659 = vst [vmem:[#allocation6_spill] sm:$0xff] %v3615_v31  ;;  %v1130_v31 = vadd.f32 %v2700_v43, %v988_v19  ;;  %v1131_v43 = vadd.f32 %v1112_v58, %v989_v21  ;;  %v1422_v49 = vadd.f32 %v1393_v60, %v1276_v23 }
 0x20b   : > { %v1260_v48 = vpop.f32.mrf.mxu1 }
 0x20c   : > { %v1278_v35 = vadd.f32 %v2724_v61, %v1130_v31  ;;  %v1279_v1 = vadd.f32 %v1260_v48, %v1131_v43  ;;  %v1281_v61 = vadd.f32 %v2727_v30, %v1133_v25 }
 0x20d   : > { %v2728_v29 = vpop.f32.mrf.mxu1 }
 0x20e   : > { %v1424_v4 = vadd.f32 %v2748_v36, %v1278_v35  ;;  %v1282_v45 = vadd.f32 %v2728_v29, %v1134_v15  ;;  %v1425_v58 = vadd.f32 %v1406_v6, %v1279_v1 }
 0x20f   : > { %v1263_v32 = vpop.f32.mrf.mxu1  ;;  %v3663_v60 = vld [vmem:[#allocation5_spill] sm:$0xff] }
 0x210   : > { %v1280_v51 = vadd.f32 %v1263_v32, %v1132_v18  ;;  %v1428_v30 = vadd.f32 %v3663_v60, %v1282_v45  ;;  %v2401_v18 = vld [vmem:[%s3649_s6] ss:$0 sm:$0xff]  ;;  %v2973_v60 = vld [vmem:[%s3050_s12 + $0x18] sm:$0xff]  }
 0x21b   : > { %v2795_v47 = vpop.f32.mrf.mxu0 }
 0x21d   : > { %v1668_v33 = vpop.f32.mrf.mxu0 }
 0x21f   : > { %v2796_v27 = vpop.f32.mrf.mxu0 }
 0x221   : > { %v2771_v5 = vpop.f32.mrf.mxu1  ;;  %v1671_v26 = vpop.f32.mrf.mxu0 }
 0x222   : > { %v1562_v56 = vadd.f32 %v2771_v5, %v1423_v10  ;;  %v3662_v5 = vld [vmem:[#allocation4_spill] sm:$0xff] }
 0x223   : > { %v1529_v50 = vpop.f32.mrf.mxu1  ;;  %v2799_v13 = vpop.f32.mrf.mxu0  ;;  %v1427_v41 = vadd.f32 %v3662_v5, %v1281_v61 }
 0x224   : > { %v1560_v59 = vadd.f32 %v1529_v50, %v1421_v37  ;;  %v1701_v55 = vadd.f32 %v2795_v47, %v1562_v56  ;;  %v3664_v47 = vld [vmem:[#allocation6_spill] sm:$0xff] }
 0x225   : > { %v2772_v53 = vpop.f32.mrf.mxu1  ;;  %v1684_v52 = vpop.f32.mrf.mxu0  ;;  %v1426_v44 = vadd.f32 %v3664_v47, %v1280_v51  ;;  %v2972_v51 = vld [vmem:[%s3050_s12] sm:$0xff]  }
 0x226   : > { %v1563_v38 = vadd.f32 %v2772_v53, %v1424_v4  ;;  %v1699_v14 = vadd.f32 %v1668_v33, %v1560_v59 }
 0x227   : > { %v1532_v62 = vpop.f32.mrf.mxu1  ;;  %v2800_v20 = vpop.f32.mrf.mxu0 }
 0x228   : > { %v1561_v40 = vadd.f32 %v1532_v62, %v1422_v49  ;;  %v1702_v36 = vadd.f32 %v2796_v27, %v1563_v38 }
 0x229   : > { %v2775_v24 = vpop.f32.mrf.mxu1  ;;  %v1687_v16 = vpop.f32.mrf.mxu0 }
 0x22a   : > { %v1700_v62 = vadd.f32 %v1671_v26, %v1561_v40  ;;  %v1566_v32 = vadd.f32 %v2775_v24, %v1427_v41 }
 0x22b   : > { %v1545_v54 = vpop.f32.mrf.mxu1 }
 0x22c   : > { %v1564_v53 = vadd.f32 %v1545_v54, %v1425_v58  ;;  %v1705_v11 = vadd.f32 %v2799_v13, %v1566_v32 }
 0x22d   : > { %v2776_v17 = vpop.f32.mrf.mxu1 }
 0x22e   : > { %v1567_v63 = vadd.f32 %v2776_v17, %v1428_v30  ;;  %v1703_v27 = vadd.f32 %v1684_v52, %v1564_v53  ;;  %v462_v30 = vunpack.c.l.bf16 %v2973_v60 }
 0x22f   : > { %v1548_v2 = vpop.f32.mrf.mxu1 }
 0x230   : > { %v1565_v54 = vadd.f32 %v1548_v2, %v1426_v44  ;;  %v1706_v24 = vadd.f32 %v2800_v20, %v1567_v63  ;;  %v2974_v44 = vld [vmem:[%s3050_s12 + $0x10] sm:$0xff]  }
 0x232   : > { %v1704_v37 = vadd.f32 %v1687_v16, %v1565_v54 }
 0x241   : > { %v2819_v31 = vpop.f32.mrf.mxu1 }
 0x242   : > { %v1840_v48 = vadd.f32 %v2819_v31, %v1701_v55  ;;  %v2971_v31 = vld [vmem:[%s3050_s12 + $0x8] sm:$0xff]   ;;  %v456_v55 = vunpack.c.l.bf16 %v2972_v51 }
 0x243   : > { %v1807_v46 = vpop.f32.mrf.mxu1  ;;  %v458_v45 = vunpack.c.l.bf16 %v2971_v31  ;;  %v459_v58 = vunpack.c.h.bf16 %v2971_v31 }
 0x244   : > { %v1838_v50 = vadd.f32 %v1807_v46, %v1699_v14  ;;  %v1855_v8 = vadd.f32 %v2400_v3, %v1840_v48 }
 0x245   : > { %v2820_v57 = vpop.f32.mrf.mxu1 }
 0x246   : > { %v1841_v29 = vadd.f32 %v2820_v57, %v1702_v36  ;;  %v1853_v42 = vadd.f32 %v2400_v3, %v1838_v50  ;;  %v1863_v34 = vmax.f32 %v1855_v8, 0.0  ;;  %v457_v36 = vunpack.c.h.bf16 %v2972_v51 }
 0x247   : > { %v1810_v6 = vpop.f32.mrf.mxu1 }
 0x248   : > { %v1856_v19 = vadd.f32 %v2400_v3, %v1841_v29  ;;  %v1839_v33 = vadd.f32 %v1810_v6, %v1700_v62  ;;  %v1861_v35 = vmax.f32 %v1853_v42, 0.0  ;;  %v460_v6 = vunpack.c.l.bf16 %v2974_v44 }
 0x249   : > { %v2823_v7 = vpop.f32.mrf.mxu1  ;;  %v463_v42 = vunpack.c.h.bf16 %v2973_v60 }
 0x24a   : > { %v1854_v12 = vadd.f32 %v2400_v3, %v1839_v33  ;;  %v1864_v28 = vmax.f32 %v1856_v19, 0.0  ;;  %v1844_v22 = vadd.f32 %v2823_v7, %v1705_v11 }
 0x24b   : > { %v1823_v21 = vpop.f32.mrf.mxu1 }
 0x24c   : > { %v1862_v9 = vmax.f32 %v1854_v12, 0.0  ;;  %v1842_v0 = vadd.f32 %v1823_v21, %v1703_v27  ;;  %v1870_v10 = vpack.c.bf16 %v1864_v28, %v1863_v34  ;;  %v1859_v25 = vadd.f32 %v2400_v3, %v1844_v22 }
 0x24d   : > { %v2824_v17 = vpop.f32.mrf.mxu1  ;;  %v461_v28 = vunpack.c.h.bf16 %v2974_v44 }
 0x24e   : > { %v1845_v23 = vadd.f32 %v2824_v17, %v1706_v24  ;;  %v1869_v39 = vpack.c.bf16 %v1862_v9, %v1861_v35  ;;  %v1857_v43 = vadd.f32 %v2400_v3, %v1842_v0  ;;  %v1867_v38 = vmax.f32 %v1859_v25, 0.0 }
 0x24f   : > { %v1826_v26 = vpop.f32.mrf.mxu1 }
 0x250   : > { %v1860_v59 = vadd.f32 %v2400_v3, %v1845_v23  ;;  %v1843_v4 = vadd.f32 %v1826_v26, %v1704_v37  ;;  %2841 = vmatprep.mubr.bf16.mxu0 %v1869_v39  ;;  %v1865_v1 = vmax.f32 %v1857_v43, 0.0 }
 0x251   : > { %2842 = vmatmul.mubr.bf16.vlgmr.msra.gmra.mxu0 %v1870_v10 }
 0x252   : > { %v1858_v56 = vadd.f32 %v2400_v3, %v1843_v4  ;;  %v1868_v2 = vmax.f32 %v1860_v59, 0.0 }
 0x254   : > { %v1866_v15 = vmax.f32 %v1858_v56, 0.0  ;;  %v1872_v61 = vpack.c.bf16 %v1868_v2, %v1867_v38 }
 0x256   : > { %v1871_v49 = vpack.c.bf16 %v1866_v15, %v1865_v1 }
 0x258   : > { %2845 = vmatprep.mubr.bf16.mxu1 %v1871_v49 }
 0x259   : > { %2846 = vmatmul.mubr.bf16.vlgmr.msra.gmra.mxu1 %v1872_v61 }
 0x311   : > { %v2843_v13 = vpop.f32.mrf.mxu0 }
 0x312   : > { %v1987_v40 = vadd.f32 %v2843_v13, %v2401_v18 }
 0x313   : > { %v1978_v14 = vpop.f32.mrf.mxu0 }
 0x314   : > { %v1979_v46 = vadd.f32 %v2401_v18, %v1978_v14  ;;  %v2011_v52 = vadd.f32 %v1987_v40, %v458_v45 }
 0x315   : > { %v2844_v50 = vpop.f32.mrf.mxu0 }
 0x316   : > { %v1990_v5 = vadd.f32 %v2844_v50, %v2401_v18  ;;  %v2009_v48 = vadd.f32 %v1979_v46, %v456_v55  ;;  %v2019_v29 = vmax.f32 %v2011_v52, 0.0 }
 0x317   : > { %v1981_v41 = vpop.f32.mrf.mxu0 }
 0x318   : > { %v2012_v57 = vadd.f32 %v1990_v5, %v459_v58  ;;  %v1982_v53 = vadd.f32 %v2401_v18, %v1981_v41  ;;  %v2017_v19 = vmax.f32 %v2009_v48, 0.0 }
 0x319   : > { %v2847_v3 = vpop.f32.mrf.mxu1 }
 0x31a   : > { %v2020_v62 = vmax.f32 %v2012_v57, 0.0  ;;  %v2010_v32 = vadd.f32 %v1982_v53, %v457_v36  ;;  %v2003_v47 = vadd.f32 %v2847_v3, %v2401_v18 }
 0x31b   : > { %v1994_v63 = vpop.f32.mrf.mxu1 }
 0x31c   : > { %v2438_v33 = vpack.c.bf16 %v2020_v62, %v2019_v29  ;;  %v2018_v20 = vmax.f32 %v2010_v32, 0.0  ;;  %v1995_v8 = vadd.f32 %v2401_v18, %v1994_v63  ;;  %v2015_v12 = vadd.f32 %v2003_v47, %v462_v30 }
 0x31d   : > { %v2848_v7 = vpop.f32.mrf.mxu1 }
 0x31e   : > { %2450 = vst [vmem:[%s278_s20 + $0x8] sm:$0xff] %v2438_v33   ;;  %v2433_v54 = vpack.c.bf16 %v2018_v20, %v2017_v19  ;;  %v2006_v27 = vadd.f32 %v2848_v7, %v2401_v18  ;;  %v2013_v21 = vadd.f32 %v1995_v8, %v460_v6  ;;  %v2023_v0 = vmax.f32 %v2015_v12, 0.0 }
 0x31f   : > { %v1997_v11 = vpop.f32.mrf.mxu1 }
 0x320   : > { %2434 = vst [vmem:[%s278_s20] sm:$0xff] %v2433_v54   ;;  %v2016_v35 = vadd.f32 %v2006_v27, %v463_v42  ;;  %v1998_v9 = vadd.f32 %v2401_v18, %v1997_v11  ;;  %v2021_v34 = vmax.f32 %v2013_v21, 0.0 }
 0x322   : > { %v2024_v24 = vmax.f32 %v2016_v35, 0.0  ;;  %v2014_v16 = vadd.f32 %v1998_v9, %v461_v28 }
 0x324   : > { %v2448_v22 = vpack.c.bf16 %v2024_v24, %v2023_v0  ;;  %v2022_v17 = vmax.f32 %v2014_v16, 0.0 }
 0x326   : > { %2452 = vst [vmem:[%s278_s20 + $0x18] sm:$0xff] %v2448_v22   ;;  %v2443_v23 = vpack.c.bf16 %v2022_v17, %v2021_v34 }
 0x328   : > { %2451 = vst [vmem:[%s278_s20 + $0x10] sm:$0xff] %v2443_v23  }
 0x329 PF: > { %s17_s24 = sadd.s32 1, %s2981_s24  }
 0x32a   : > { %p14_p4 = scmp.ge.s32.totalorder %s17_s24, 4  }
 0x32c   :  { %16 = sbr.rel (!%p14_p4) target bundleno = 1 (0x1), region = 86 }

</bundles_post_ra>
